<compile_context>
chip_gen: v7x
topology: tpu7x:2x2x1
jax: 0.10.0
libtpu: 0.0.40
codegen_flags: <defaults>
</compile_context>

<pallas_src>
import functools

import jax
import jax.numpy as jnp
from jax import lax
from jax.experimental import pallas as pl
from jax.experimental.pallas import tpu as pltpu


def _round_up(v, m):
    return ((v + m - 1) // m) * m


def _const_spec(shape):
    zeros = (0,) * len(shape)
    return pl.BlockSpec(shape, lambda l, t: zeros)


# ---------------------------------------------------------------------------
# Fully fused forward kernel (grid = (num_layers, num_row_tiles)).
# ---------------------------------------------------------------------------
def gin_fused_kernel(*refs, num_layers, num_tiles, tile_m, d1max, emb, num_mlp_extra):
    it = iter(refs)
    ahat_ref = next(it)        # [tile_m, Np]    bf16 row tile of augmented adjacency
    x_ref = next(it)           # [Np, d1max]     bf16 node features (zero padded)
    onehot_ref = next(it)      # [Gp, Np]        bf16 graph membership
    bidx_ref = next(it)        # [Np, 1]         int32 graph id per node (-1 = padding)
    cnt_ref = next(it)         # [Gp, 1]         f32 nodes per graph (host precomputed)
    w1_ref = next(it)          # [1, d1max, emb] bf16 (this layer's first conv weight)
    w2_ref = next(it)          # [1, emb, emb]   bf16 (this layer's second conv weight)
    wa_ref = next(it); wb_ref = next(it); wc_ref = next(it); b0_ref = next(it)
    mlp_extra = [(next(it), next(it)) for _ in range(num_mlp_extra)]
    outw_ref = next(it); outb_ref = next(it)
    o_ref = next(it)           # [Gp, 128] f32 (col 0 = prediction)
    h_cur = next(it)           # [Np, d1max] bf16 scratch: current layer input
    h_next = next(it)          # [Np, d1max] bf16 scratch: current layer output

    l = pl.program_id(0)
    t = pl.program_id(1)

    @pl.when((l == 0) & (t == 0))
    def _init():
        h_cur[...] = x_ref[...]
        h_next[...] = jnp.zeros_like(h_next)

    # --- GINConv for this row tile: relu(relu((Ahat_tile @ h) @ W1) @ W2) ----------
    # bf16 MXU inputs everywhere with f32 accumulation.
    z = jnp.dot(ahat_ref[...], h_cur[...], preferred_element_type=jnp.float32)
    z = jnp.dot(z.astype(jnp.bfloat16), w1_ref[0], preferred_element_type=jnp.float32)
    z = jnp.maximum(z, 0.0)
    z = jnp.dot(z.astype(jnp.bfloat16), w2_ref[0], preferred_element_type=jnp.float32)
    z = jnp.maximum(z, 0.0)                    # post-GINConv F.relu; dropout = identity (eval)

    zb = z.astype(jnp.bfloat16)
    if d1max > emb:                            # static pad so unused h_next columns stay zero
        zb = jnp.concatenate(
            [zb, jnp.zeros((zb.shape[0], d1max - emb), jnp.bfloat16)], axis=1)
    row0 = pl.multiple_of(t * tile_m, tile_m)
    h_next[pl.ds(row0, tile_m), :] = zb

    # --- layer boundary: promote h_next -> h_cur ----------------------------------
    @pl.when(t == num_tiles - 1)
    def _swap():
        h_cur[...] = h_next[...]

    # --- final grid point: pooling + readout MLP + output head --------------------
    @pl.when((l == num_layers - 1) & (t == num_tiles - 1))
    def _readout():
        h_b = h_cur[...]
        if d1max > emb:
            h_b = h_b[:, :emb]                 # [Np, emb] bf16
        cnt = cnt_ref[...]                     # [Gp, 1] f32
        g_pad = cnt.shape[0]

        # global_add_pool / global_mean_pool via one MXU matmul + exact divide
        sump = jnp.dot(onehot_ref[...], h_b, preferred_element_type=jnp.float32)
        meanp = sump / jnp.maximum(cnt, 1.0)

        # global_max_pool: per-graph masked sublane reduce, O(Np*emb) live memory
        h_f = h_b.astype(jnp.float32)
        bidx = bidx_ref[...]                   # [Np, 1] int32 (-1 for padded nodes)
        neg = jnp.float32(-jnp.inf)
        g_iota = lax.broadcasted_iota(jnp.int32, (g_pad, 1), 0)

        def max_body(g, acc):
            row = jnp.max(jnp.where(bidx == g, h_f, neg), axis=0, keepdims=True)
            return jnp.where(g_iota == g, row, acc)

        maxp = lax.fori_loop(0, g_pad, max_body,
                             jnp.full((g_pad, h_f.shape[1]), neg, jnp.float32))
        maxp = jnp.where(cnt > 0.0, maxp, 0.0)   # guard empty / padded graphs

        # readout MLP; first-layer weight pre-split per pooling branch (no concat)
        hid = (jnp.dot(maxp.astype(jnp.bfloat16), wa_ref[...],
                       preferred_element_type=jnp.float32)
               + jnp.dot(meanp.astype(jnp.bfloat16), wb_ref[...],
                         preferred_element_type=jnp.float32)
               + jnp.dot(sump.astype(jnp.bfloat16), wc_ref[...],
                         preferred_element_type=jnp.float32)
               + b0_ref[...])
        hid = jnp.maximum(hid, 0.0)
        for (w_ref, b_ref) in mlp_extra:
            hid = jnp.dot(hid.astype(jnp.bfloat16), w_ref[...],
                          preferred_element_type=jnp.float32) + b_ref[...]
            hid = jnp.maximum(hid, 0.0)

        # output head (weights zero-padded to 128 lanes -> single unmasked store)
        o_ref[...] = (jnp.dot(hid.astype(jnp.bfloat16), outw_ref[...],
                              preferred_element_type=jnp.float32) + outb_ref[...])


# ---------------------------------------------------------------------------
# Parameter init (deterministic, uniform(-1/sqrt(fan_in), 1/sqrt(fan_in)))
# ---------------------------------------------------------------------------
def init_params(key, feature_size, embedding_size, dense_neuron,
                num_gin_layers, num_mlp_layers):
    keys = iter(jax.random.split(key, 64))

    def lin_w(fan_in, fan_out):
        s = 1.0 / float(fan_in) ** 0.5
        return jax.random.uniform(next(keys), (fan_in, fan_out), jnp.float32, -s, s)

    def lin_b(fan_in, fan_out):
        s = 1.0 / float(fan_in) ** 0.5
        return jax.random.uniform(next(keys), (1, fan_out), jnp.float32, -s, s)

    params = {"eps": 0.0}
    params["conv0_w1"] = lin_w(feature_size, embedding_size)
    params["conv0_w2"] = lin_w(embedding_size, embedding_size)
    params["gin_layers"] = [
        (lin_w(embedding_size, embedding_size), lin_w(embedding_size, embedding_size))
        for _ in range(num_gin_layers - 1)
    ]
    mlp = []
    mlp_in, mlp_out = embedding_size * 3, dense_neuron
    for _ in range(num_mlp_layers):
        mlp.append((lin_w(mlp_in, mlp_out), lin_b(mlp_in, mlp_out)))
        mlp_in = mlp_out
        mlp_out = max(1, mlp_in // 2)
    params["mlp"] = mlp
    params["out_w"] = lin_w(mlp_in, 1)
    params["out_b"] = lin_b(mlp_in, 1)
    return params


# ---------------------------------------------------------------------------
# Full forward pass (single fused pallas_call, row-tiled Ahat stream)
# ---------------------------------------------------------------------------
def gin_forward(params, x, edge_index, batch_index, num_graphs):
    n, f = x.shape
    emb = params["conv0_w1"].shape[1]
    eps = params["eps"]
    num_layers = 1 + len(params["gin_layers"])
    d1max = max(f, emb)
    bf16 = jnp.bfloat16

    n_pad = _round_up(n, 128)       # lane-aligned node axis
    g_pad = _round_up(num_graphs, 8)
    head_pad = 128                  # lane-dense final store

    if n_pad % 512 == 0:
        tile_m = 512
    elif n_pad % 256 == 0:
        tile_m = 256
    else:
        tile_m = 128
    tile_m = min(tile_m, n_pad)
    num_tiles = n_pad // tile_m

    # Augmented adjacency built directly in bf16: Ahat[i, j] = #edges j->i ; diag += (1+eps).
    # Small integer edge counts + 1.0 are exact in bf16.
    ahat = jnp.zeros((n_pad, n_pad), bf16)
    ahat = ahat.at[edge_index[1], edge_index[0]].add(1.0)
    diag = jnp.arange(n)
    ahat = ahat.at[diag, diag].add(1.0 + eps)
    # NOTE: self-loops already present in edge_index stack on top of (1+eps), matching the
    # previous implementation's semantics.

    x_pad = jnp.zeros((n_pad, d1max), bf16).at[:n, :f].set(x.astype(bf16))

    bidx_flat = jnp.full((n_pad,), -1, jnp.int32).at[:n].set(batch_index.astype(jnp.int32))
    gids = jnp.arange(g_pad, dtype=jnp.int32)
    member = bidx_flat[None, :] == gids[:, None]
    onehot = member.astype(bf16)                                        # [Gp, Np]
    cnt = jnp.sum(member.astype(jnp.float32), axis=1, keepdims=True)    # [Gp, 1] host-side
    bidx2d = bidx_flat.reshape(n_pad, 1)

    # Per-layer conv weights stacked (bf16, zero row padding up to d1max).
    w1_list = [params["conv0_w1"]] + [w1 for (w1, _) in params["gin_layers"]]
    w2_list = [params["conv0_w2"]] + [w2 for (_, w2) in params["gin_layers"]]
    w1_stack = jnp.zeros((num_layers, d1max, emb), bf16)
    for i, w in enumerate(w1_list):
        w1_stack = w1_stack.at[i, :w.shape[0], :].set(w.astype(bf16))
    w2_stack = jnp.stack([w.astype(bf16) for w in w2_list], axis=0)

    # Readout MLP: first weight split per pooling branch (gmp | gap | gadp), all bf16.
    (w0, b0) = params["mlp"][0]
    wa = w0[:emb].astype(bf16)
    wb = w0[emb:2 * emb].astype(bf16)
    wc = w0[2 * emb:3 * emb].astype(bf16)
    mlp_extra = []
    for (w, b) in params["mlp"][1:]:
        mlp_extra += [w.astype(bf16), b]
    num_mlp_extra = len(params["mlp"]) - 1

    out_in = params["out_w"].shape[0]
    out_w = jnp.zeros((out_in, head_pad), bf16).at[:, :1].set(params["out_w"].astype(bf16))
    out_b = jnp.zeros((1, head_pad), jnp.float32).at[:, :1].set(params["out_b"])

    operands = ([ahat, x_pad, onehot, bidx2d, cnt, w1_stack, w2_stack,
                 wa, wb, wc, b0] + mlp_extra + [out_w, out_b])

    in_specs = [
        pl.BlockSpec((tile_m, n_pad), lambda l, t: (t, 0)),         # Ahat row tiles (streamed)
        _const_spec(x_pad.shape),
        _const_spec(onehot.shape),
        _const_spec(bidx2d.shape),
        _const_spec(cnt.shape),
        pl.BlockSpec((1, d1max, emb), lambda l, t: (l, 0, 0)),      # per-layer W1
        pl.BlockSpec((1, emb, emb), lambda l, t: (l, 0, 0)),        # per-layer W2
    ]
    in_specs += [_const_spec(op.shape) for op in operands[7:]]

    # VMEM budget: 2x pipelined Ahat tiles + 2x resident operands + scratches + output.
    def _nbytes(a):
        return int(a.size) * a.dtype.itemsize
    resident = 2 * tile_m * n_pad * 2
    resident += sum(2 * _nbytes(op) for op in operands[1:])
    resident += 2 * n_pad * d1max * 2
    resident += 2 * g_pad * head_pad * 4
    vmem_limit = int(min(max(resident + (8 << 20), 32 << 20), 64 << 20))

    kernel = functools.partial(
        gin_fused_kernel, num_layers=num_layers, num_tiles=num_tiles,
        tile_m=tile_m, d1max=d1max, emb=emb, num_mlp_extra=num_mlp_extra)

    out_pad = pl.pallas_call(
        kernel,
        out_shape=jax.ShapeDtypeStruct((g_pad, head_pad), jnp.float32),
        grid=(num_layers, num_tiles),
        in_specs=in_specs,
        out_specs=pl.BlockSpec((g_pad, head_pad), lambda l, t: (0, 0)),
        scratch_shapes=[pltpu.VMEM((n_pad, d1max), bf16),
                        pltpu.VMEM((n_pad, d1max), bf16)],
        compiler_params=pltpu.CompilerParams(
            dimension_semantics=("arbitrary", "arbitrary"),
            vmem_limit_bytes=vmem_limit),
    )(*operands)

    return out_pad[:num_graphs, :1]


if __name__ == "__main__":
    key = jax.random.PRNGKey(0)
    feature_size = 16
    model_params = {
        "embedding_size": 32,
        "dense_neuron": 64,
        "num_gin_layers": 3,
        "num_mlp_layers": 2,
        "dropout_value": 0.2,   # identity at inference
        "dropout_mlp": 0.2,     # identity at inference
    }
    N, G, num_edges = 24, 2, 48

    kx, ke1, ke2, kp = jax.random.split(key, 4)
    x = jax.random.normal(kx, (N, feature_size), jnp.float32)
    src = jax.random.randint(ke1, (num_edges,), 0, N, dtype=jnp.int32)
    dst = jax.random.randint(ke2, (num_edges,), 0, N, dtype=jnp.int32)
    edge_index = jnp.stack([src, dst], axis=0)                        # [2, num_edges]
    batch_index = jnp.concatenate(
        [jnp.zeros(N // 2, jnp.int32), jnp.ones(N - N // 2, jnp.int32)])  # [N]

    params = init_params(kp, feature_size, model_params["embedding_size"],
                         model_params["dense_neuron"], model_params["num_gin_layers"],
                         model_params["num_mlp_layers"])

    out = gin_forward(params, x, edge_index, batch_index, G)
    jax.block_until_ready(out)
    assert out.shape == (G, 1) and out.dtype == jnp.float32
    assert bool(jnp.all(jnp.isfinite(out)))
    print("KERNEL_OK")
</pallas_src>

<mosaic_0001>
module attributes {stable_mosaic.version = 11 : i64} {
  func.func @gin_fused_kernel(%arg0: i32, %arg1: i32, %arg2: memref<128x128xbf16, #tpu.memory_space<vmem>>, %arg3: memref<128x32xbf16, #tpu.memory_space<vmem>>, %arg4: memref<8x128xbf16, #tpu.memory_space<vmem>>, %arg5: memref<128x1xi32, #tpu.memory_space<vmem>>, %arg6: memref<8x1xf32, #tpu.memory_space<vmem>>, %arg7: memref<1x32x32xbf16, #tpu.memory_space<vmem>>, %arg8: memref<1x32x32xbf16, #tpu.memory_space<vmem>>, %arg9: memref<32x64xbf16, #tpu.memory_space<vmem>>, %arg10: memref<32x64xbf16, #tpu.memory_space<vmem>>, %arg11: memref<32x64xbf16, #tpu.memory_space<vmem>>, %arg12: memref<1x64xf32, #tpu.memory_space<vmem>>, %arg13: memref<64x32xbf16, #tpu.memory_space<vmem>>, %arg14: memref<1x32xf32, #tpu.memory_space<vmem>>, %arg15: memref<32x128xbf16, #tpu.memory_space<vmem>>, %arg16: memref<1x128xf32, #tpu.memory_space<vmem>>, %arg17: memref<8x128xf32, #tpu.memory_space<vmem>>, %arg18: memref<128x32xbf16, #tpu.memory_space<vmem>>, %arg19: memref<128x32xbf16, #tpu.memory_space<vmem>>) attributes {dimension_semantics = [#tpu.dimension_semantics<arbitrary>, #tpu.dimension_semantics<arbitrary>], iteration_bounds = array<i64: 3, 1>, scalar_prefetch = 0 : i64, scratch_operands = 2 : i64, tpu.core_type = #tpu.core_type<tc>, window_params = [{transform_indices = @transform_0, window_bounds = array<i64: 128, 128>}, {pipeline_mode = #tpu.pipeline_mode<synchronous>, transform_indices = @transform_1, window_bounds = array<i64: 128, 32>}, {pipeline_mode = #tpu.pipeline_mode<synchronous>, transform_indices = @transform_2, window_bounds = array<i64: 8, 128>}, {pipeline_mode = #tpu.pipeline_mode<synchronous>, transform_indices = @transform_3, window_bounds = array<i64: 128, 1>}, {pipeline_mode = #tpu.pipeline_mode<synchronous>, transform_indices = @transform_4, window_bounds = array<i64: 8, 1>}, {transform_indices = @transform_5, window_bounds = array<i64: 1, 32, 32>}, {transform_indices = @transform_6, window_bounds = array<i64: 1, 32, 32>}, {pipeline_mode = #tpu.pipeline_mode<synchronous>, transform_indices = @transform_7, window_bounds = array<i64: 32, 64>}, {pipeline_mode = #tpu.pipeline_mode<synchronous>, transform_indices = @transform_8, window_bounds = array<i64: 32, 64>}, {pipeline_mode = #tpu.pipeline_mode<synchronous>, transform_indices = @transform_9, window_bounds = array<i64: 32, 64>}, {pipeline_mode = #tpu.pipeline_mode<synchronous>, transform_indices = @transform_10, window_bounds = array<i64: 1, 64>}, {pipeline_mode = #tpu.pipeline_mode<synchronous>, transform_indices = @transform_11, window_bounds = array<i64: 64, 32>}, {pipeline_mode = #tpu.pipeline_mode<synchronous>, transform_indices = @transform_12, window_bounds = array<i64: 1, 32>}, {pipeline_mode = #tpu.pipeline_mode<synchronous>, transform_indices = @transform_13, window_bounds = array<i64: 32, 128>}, {pipeline_mode = #tpu.pipeline_mode<synchronous>, transform_indices = @transform_14, window_bounds = array<i64: 1, 128>}, {pipeline_mode = #tpu.pipeline_mode<synchronous>, transform_indices = @transform_15, window_bounds = array<i64: 8, 128>}]} {
    %c0_i32 = arith.constant 0 : i32
    %0 = arith.cmpi eq, %arg0, %c0_i32 : i32
    %c0_i32_0 = arith.constant 0 : i32
    %1 = arith.cmpi eq, %arg1, %c0_i32_0 : i32
    %2 = arith.andi %0, %1 : i1
    %3 = arith.extui %2 : i1 to i32
    %c0_i32_1 = arith.constant 0 : i32
    %4 = arith.cmpi ne, %3, %c0_i32_1 : i32
    scf.if %4 {
      %c0_20 = arith.constant 0 : index
      %c0_21 = arith.constant 0 : index
      %33 = vector.load %arg3[%c0_20, %c0_21] : memref<128x32xbf16, #tpu.memory_space<vmem>>, vector<128x32xbf16>
      %c0_22 = arith.constant 0 : index
      %c0_23 = arith.constant 0 : index
      %34 = vector.load %arg18[%c0_22, %c0_23] : memref<128x32xbf16, #tpu.memory_space<vmem>>, vector<128x32xbf16>
      tpu.vector_store %arg18[%c0_22, %c0_23], %33 {strides = array<i32>} : memref<128x32xbf16, #tpu.memory_space<vmem>>, vector<128x32xbf16>,
      %cst_24 = arith.constant 0.000000e+00 : bf16
      %35 = vector.broadcast %cst_24 : bf16 to vector<128x32xbf16>
      %c0_25 = arith.constant 0 : index
      %c0_26 = arith.constant 0 : index
      %36 = vector.load %arg19[%c0_25, %c0_26] : memref<128x32xbf16, #tpu.memory_space<vmem>>, vector<128x32xbf16>
      tpu.vector_store %arg19[%c0_25, %c0_26], %35 {strides = array<i32>} : memref<128x32xbf16, #tpu.memory_space<vmem>>, vector<128x32xbf16>,
    } else {
    }
    %c0 = arith.constant 0 : index
    %c0_2 = arith.constant 0 : index
    %5 = vector.load %arg2[%c0, %c0_2] : memref<128x128xbf16, #tpu.memory_space<vmem>>, vector<128x128xbf16>
    %c0_3 = arith.constant 0 : index
    %c0_4 = arith.constant 0 : index
    %6 = vector.load %arg18[%c0_3, %c0_4] : memref<128x32xbf16, #tpu.memory_space<vmem>>, vector<128x32xbf16>
    %cst = arith.constant dense<0.000000e+00> : vector<128x32xf32>
    %7 = tpu.matmul %5, %6, %cst {dimension_numbers = #tpu.dot_dimension_numbers<[1], [0], [0], [1], [0, 0, 1, 1], [], []>} : vector<128x128xbf16>, vector<128x32xbf16>, vector<128x32xf32> -> vector<128x32xf32>
    %8 = arith.truncf %7 : vector<128x32xf32> to vector<128x32xbf16>
    %c0_5 = arith.constant 0 : index
    %c0_6 = arith.constant 0 : index
    %c0_7 = arith.constant 0 : index
    %9 = vector.load %arg7[%c0_5, %c0_6, %c0_7] : memref<1x32x32xbf16, #tpu.memory_space<vmem>>, vector<1x32x32xbf16>
    %10 = vector.shape_cast %9 : vector<1x32x32xbf16> to vector<32x32xbf16>
    %cst_8 = arith.constant dense<0.000000e+00> : vector<128x32xf32>
    %11 = tpu.matmul %8, %10, %cst_8 {dimension_numbers = #tpu.dot_dimension_numbers<[1], [0], [0], [1], [0, 0, 1, 1], [], []>} : vector<128x32xbf16>, vector<32x32xbf16>, vector<128x32xf32> -> vector<128x32xf32>
    %cst_9 = arith.constant 0.000000e+00 : f32
    %12 = vector.broadcast %cst_9 : f32 to vector<128x32xf32>
    %13 = arith.maximumf %11, %12 : vector<128x32xf32>
    %14 = arith.truncf %13 : vector<128x32xf32> to vector<128x32xbf16>
    %c0_10 = arith.constant 0 : index
    %c0_11 = arith.constant 0 : index
    %c0_12 = arith.constant 0 : index
    %15 = vector.load %arg8[%c0_10, %c0_11, %c0_12] : memref<1x32x32xbf16, #tpu.memory_space<vmem>>, vector<1x32x32xbf16>
    %16 = vector.shape_cast %15 : vector<1x32x32xbf16> to vector<32x32xbf16>
    %cst_13 = arith.constant dense<0.000000e+00> : vector<128x32xf32>
    %17 = tpu.matmul %14, %16, %cst_13 {dimension_numbers = #tpu.dot_dimension_numbers<[1], [0], [0], [1], [0, 0, 1, 1], [], []>} : vector<128x32xbf16>, vector<32x32xbf16>, vector<128x32xf32> -> vector<128x32xf32>
    %cst_14 = arith.constant 0.000000e+00 : f32
    %18 = vector.broadcast %cst_14 : f32 to vector<128x32xf32>
    %19 = arith.maximumf %17, %18 : vector<128x32xf32>
    %20 = arith.truncf %19 : vector<128x32xf32> to vector<128x32xbf16>
    %c128_i32 = arith.constant 128 : i32
    %21 = arith.muli %arg1, %c128_i32 : i32
    %22 = tpu.assume_multiple %21, 128 : i32
    %23 = arith.index_cast %22 : i32 to index
    %c0_15 = arith.constant 0 : index
    %24 = vector.load %arg19[%23, %c0_15] : memref<128x32xbf16, #tpu.memory_space<vmem>>, vector<128x32xbf16>
    tpu.vector_store %arg19[%23, %c0_15], %20 {strides = array<i32>} : memref<128x32xbf16, #tpu.memory_space<vmem>>, vector<128x32xbf16>,
    %c0_i32_16 = arith.constant 0 : i32
    %25 = arith.cmpi eq, %arg1, %c0_i32_16 : i32
    %26 = arith.extui %25 : i1 to i32
    %c0_i32_17 = arith.constant 0 : i32
    %27 = arith.cmpi ne, %26, %c0_i32_17 : i32
    scf.if %27 {
      %c0_20 = arith.constant 0 : index
      %c0_21 = arith.constant 0 : index
      %33 = vector.load %arg19[%c0_20, %c0_21] : memref<128x32xbf16, #tpu.memory_space<vmem>>, vector<128x32xbf16>
      %c0_22 = arith.constant 0 : index
      %c0_23 = arith.constant 0 : index
      %34 = vector.load %arg18[%c0_22, %c0_23] : memref<128x32xbf16, #tpu.memory_space<vmem>>, vector<128x32xbf16>
      tpu.vector_store %arg18[%c0_22, %c0_23], %33 {strides = array<i32>} : memref<128x32xbf16, #tpu.memory_space<vmem>>, vector<128x32xbf16>,
    } else {
    }
    %c2_i32 = arith.constant 2 : i32
    %28 = arith.cmpi eq, %arg0, %c2_i32 : i32
    %c0_i32_18 = arith.constant 0 : i32
    %29 = arith.cmpi eq, %arg1, %c0_i32_18 : i32
    %30 = arith.andi %28, %29 : i1
    %31 = arith.extui %30 : i1 to i32
    %c0_i32_19 = arith.constant 0 : i32
    %32 = arith.cmpi ne, %31, %c0_i32_19 : i32
    scf.if %32 {
      %c0_20 = arith.constant 0 : index
      %c0_21 = arith.constant 0 : index
      %33 = vector.load %arg18[%c0_20, %c0_21] : memref<128x32xbf16, #tpu.memory_space<vmem>>, vector<128x32xbf16>
      %c0_22 = arith.constant 0 : index
      %c0_23 = arith.constant 0 : index
      %34 = vector.load %arg6[%c0_22, %c0_23] : memref<8x1xf32, #tpu.memory_space<vmem>>, vector<8x1xf32>
      %c0_24 = arith.constant 0 : index
      %c0_25 = arith.constant 0 : index
      %35 = vector.load %arg4[%c0_24, %c0_25] : memref<8x128xbf16, #tpu.memory_space<vmem>>, vector<8x128xbf16>
      %cst_26 = arith.constant dense<0.000000e+00> : vector<8x32xf32>
      %36 = tpu.matmul %35, %33, %cst_26 {dimension_numbers = #tpu.dot_dimension_numbers<[1], [0], [0], [1], [0, 0, 1, 1], [], []>} : vector<8x128xbf16>, vector<128x32xbf16>, vector<8x32xf32> -> vector<8x32xf32>
      %cst_27 = arith.constant 1.000000e+00 : f32
      %37 = vector.broadcast %cst_27 : f32 to vector<8x1xf32>
      %38 = arith.maximumf %34, %37 : vector<8x1xf32>
      %39 = vector.broadcast %38 : vector<8x1xf32> to vector<8x32xf32>
      %40 = arith.divf %36, %39 : vector<8x32xf32>
      %41 = arith.extf %33 : vector<128x32xbf16> to vector<128x32xf32>
      %c0_28 = arith.constant 0 : index
      %c0_29 = arith.constant 0 : index
      %42 = vector.load %arg5[%c0_28, %c0_29] : memref<128x1xi32, #tpu.memory_space<vmem>>, vector<128x1xi32>
      %43 = tpu.iota {dimensions = array<i32: 0>} : vector<8x1xi32>
      %cst_30 = arith.constant 0xFF800000 : f32
      %44 = vector.broadcast %cst_30 : f32 to vector<8x32xf32>
      %cst_31 = arith.constant 0xFF800000 : f32
      %c0_i32_32 = arith.constant 0 : i32
      %c8_i32 = arith.constant 8 : i32
      %45 = arith.addi %c0_i32_32, %c8_i32 : i32
      %c1_i32 = arith.constant 1 : i32
      %46 = scf.for %arg20 = %c0_i32_32 to %45 step %c1_i32 iter_args(%arg21 = %44) -> (vector<8x32xf32>)  : i32 {
        %84 = vector.broadcast %arg20 : i32 to vector<128x1xi32>
        %85 = arith.cmpi eq, %42, %84 : vector<128x1xi32>
        %86 = vector.shape_cast %85 : vector<128x1xi1> to vector<128x1xi1>
        %87 = vector.broadcast %86 : vector<128x1xi1> to vector<128x32xi1>
        %88 = vector.broadcast %cst_31 : f32 to vector<128x32xf32>
        %89 = arith.select %87, %41, %88 : vector<128x32xi1>, vector<128x32xf32>
        %cst_61 = arith.constant dense<0xFF800000> : vector<32xf32>
        %90 = vector.multi_reduction <maximumf>, %89, %cst_61 [0] : vector<128x32xf32> to vector<32xf32>
        %91 = vector.shape_cast %90 : vector<32xf32> to vector<1x32xf32>
        %92 = vector.broadcast %arg20 : i32 to vector<8x1xi32>
        %93 = arith.cmpi eq, %43, %92 : vector<8x1xi32>
        %94 = vector.shape_cast %93 : vector<8x1xi1> to vector<8x1xi1>
        %95 = vector.broadcast %94 : vector<8x1xi1> to vector<8x32xi1>
        %96 = vector.shape_cast %91 : vector<1x32xf32> to vector<1x32xf32>
        %97 = vector.broadcast %96 : vector<1x32xf32> to vector<8x32xf32>
        %98 = arith.select %95, %97, %arg21 : vector<8x32xi1>, vector<8x32xf32>
        scf.yield %98 : vector<8x32xf32>
      }
      %c8_i32_33 = arith.constant 8 : i32
      %cst_34 = arith.constant 0.000000e+00 : f32
      %47 = vector.broadcast %cst_34 : f32 to vector<8x1xf32>
      %48 = arith.cmpf ogt, %34, %47 : vector<8x1xf32>
      %cst_35 = arith.constant 0.000000e+00 : f32
      %49 = vector.shape_cast %48 : vector<8x1xi1> to vector<8x1xi1>
      %50 = vector.broadcast %49 : vector<8x1xi1> to vector<8x32xi1>
      %51 = vector.broadcast %cst_35 : f32 to vector<8x32xf32>
      %52 = arith.select %50, %46, %51 : vector<8x32xi1>, vector<8x32xf32>
      %53 = arith.truncf %52 : vector<8x32xf32> to vector<8x32xbf16>
      %c0_36 = arith.constant 0 : index
      %c0_37 = arith.constant 0 : index
      %54 = vector.load %arg9[%c0_36, %c0_37] : memref<32x64xbf16, #tpu.memory_space<vmem>>, vector<32x64xbf16>
      %cst_38 = arith.constant dense<0.000000e+00> : vector<8x64xf32>
      %55 = tpu.matmul %53, %54, %cst_38 {dimension_numbers = #tpu.dot_dimension_numbers<[1], [0], [0], [1], [0, 0, 1, 1], [], []>} : vector<8x32xbf16>, vector<32x64xbf16>, vector<8x64xf32> -> vector<8x64xf32>
      %56 = arith.truncf %40 : vector<8x32xf32> to vector<8x32xbf16>
      %c0_39 = arith.constant 0 : index
      %c0_40 = arith.constant 0 : index
      %57 = vector.load %arg10[%c0_39, %c0_40] : memref<32x64xbf16, #tpu.memory_space<vmem>>, vector<32x64xbf16>
      %cst_41 = arith.constant dense<0.000000e+00> : vector<8x64xf32>
      %58 = tpu.matmul %56, %57, %cst_41 {dimension_numbers = #tpu.dot_dimension_numbers<[1], [0], [0], [1], [0, 0, 1, 1], [], []>} : vector<8x32xbf16>, vector<32x64xbf16>, vector<8x64xf32> -> vector<8x64xf32>
      %59 = arith.addf %55, %58 : vector<8x64xf32>
      %60 = arith.truncf %36 : vector<8x32xf32> to vector<8x32xbf16>
      %c0_42 = arith.constant 0 : index
      %c0_43 = arith.constant 0 : index
      %61 = vector.load %arg11[%c0_42, %c0_43] : memref<32x64xbf16, #tpu.memory_space<vmem>>, vector<32x64xbf16>
      %cst_44 = arith.constant dense<0.000000e+00> : vector<8x64xf32>
      %62 = tpu.matmul %60, %61, %cst_44 {dimension_numbers = #tpu.dot_dimension_numbers<[1], [0], [0], [1], [0, 0, 1, 1], [], []>} : vector<8x32xbf16>, vector<32x64xbf16>, vector<8x64xf32> -> vector<8x64xf32>
      %63 = arith.addf %59, %62 : vector<8x64xf32>
      %c0_45 = arith.constant 0 : index
      %c0_46 = arith.constant 0 : index
      %64 = vector.load %arg12[%c0_45, %c0_46] : memref<1x64xf32, #tpu.memory_space<vmem>>, vector<1x64xf32>
      %65 = vector.broadcast %64 : vector<1x64xf32> to vector<8x64xf32>
      %66 = arith.addf %63, %65 : vector<8x64xf32>
      %cst_47 = arith.constant 0.000000e+00 : f32
      %67 = vector.broadcast %cst_47 : f32 to vector<8x64xf32>
      %68 = arith.maximumf %66, %67 : vector<8x64xf32>
      %69 = arith.truncf %68 : vector<8x64xf32> to vector<8x64xbf16>
      %c0_48 = arith.constant 0 : index
      %c0_49 = arith.constant 0 : index
      %70 = vector.load %arg13[%c0_48, %c0_49] : memref<64x32xbf16, #tpu.memory_space<vmem>>, vector<64x32xbf16>
      %cst_50 = arith.constant dense<0.000000e+00> : vector<8x32xf32>
      %71 = tpu.matmul %69, %70, %cst_50 {dimension_numbers = #tpu.dot_dimension_numbers<[1], [0], [0], [1], [0, 0, 1, 1], [], []>} : vector<8x64xbf16>, vector<64x32xbf16>, vector<8x32xf32> -> vector<8x32xf32>
      %c0_51 = arith.constant 0 : index
      %c0_52 = arith.constant 0 : index
      %72 = vector.load %arg14[%c0_51, %c0_52] : memref<1x32xf32, #tpu.memory_space<vmem>>, vector<1x32xf32>
      %73 = vector.broadcast %72 : vector<1x32xf32> to vector<8x32xf32>
      %74 = arith.addf %71, %73 : vector<8x32xf32>
      %cst_53 = arith.constant 0.000000e+00 : f32
      %75 = vector.broadcast %cst_53 : f32 to vector<8x32xf32>
      %76 = arith.maximumf %74, %75 : vector<8x32xf32>
      %77 = arith.truncf %76 : vector<8x32xf32> to vector<8x32xbf16>
      %c0_54 = arith.constant 0 : index
      %c0_55 = arith.constant 0 : index
      %78 = vector.load %arg15[%c0_54, %c0_55] : memref<32x128xbf16, #tpu.memory_space<vmem>>, vector<32x128xbf16>
      %cst_56 = arith.constant dense<0.000000e+00> : vector<8x128xf32>
      %79 = tpu.matmul %77, %78, %cst_56 {dimension_numbers = #tpu.dot_dimension_numbers<[1], [0], [0], [1], [0, 0, 1, 1], [], []>} : vector<8x32xbf16>, vector<32x128xbf16>, vector<8x128xf32> -> vector<8x128xf32>
      %c0_57 = arith.constant 0 : index
      %c0_58 = arith.constant 0 : index
      %80 = vector.load %arg16[%c0_57, %c0_58] : memref<1x128xf32, #tpu.memory_space<vmem>>, vector<1x128xf32>
      %81 = vector.broadcast %80 : vector<1x128xf32> to vector<8x128xf32>
      %82 = arith.addf %79, %81 : vector<8x128xf32>
      %c0_59 = arith.constant 0 : index
      %c0_60 = arith.constant 0 : index
      %83 = vector.load %arg17[%c0_59, %c0_60] : memref<8x128xf32, #tpu.memory_space<vmem>>, vector<8x128xf32>
      tpu.vector_store %arg17[%c0_59, %c0_60], %82 {strides = array<i32>} : memref<8x128xf32, #tpu.memory_space<vmem>>, vector<8x128xf32>,
    } else {
    }
    return
  }
  func.func @transform_0(%arg0: i32, %arg1: i32) -> (i32, i32) {
    %c0_i32 = arith.constant 0 : i32
    %c0_i32_0 = arith.constant 0 : i32
    return %arg1, %c0_i32 : i32, i32
  }
  func.func @transform_1(%arg0: i32, %arg1: i32) -> (i32, i32) {
    %c0_i32 = arith.constant 0 : i32
    %c0_i32_0 = arith.constant 0 : i32
    %c0_i32_1 = arith.constant 0 : i32
    return %c0_i32, %c0_i32_0 : i32, i32
  }
  func.func @transform_2(%arg0: i32, %arg1: i32) -> (i32, i32) {
    %c0_i32 = arith.constant 0 : i32
    %c0_i32_0 = arith.constant 0 : i32
    %c0_i32_1 = arith.constant 0 : i32
    return %c0_i32, %c0_i32_0 : i32, i32
  }
  func.func @transform_3(%arg0: i32, %arg1: i32) -> (i32, i32) {
    %c0_i32 = arith.constant 0 : i32
    %c0_i32_0 = arith.constant 0 : i32
    %c0_i32_1 = arith.constant 0 : i32
    return %c0_i32, %c0_i32_0 : i32, i32
  }
  func.func @transform_4(%arg0: i32, %arg1: i32) -> (i32, i32) {
    %c0_i32 = arith.constant 0 : i32
    %c0_i32_0 = arith.constant 0 : i32
    %c0_i32_1 = arith.constant 0 : i32
    return %c0_i32, %c0_i32_0 : i32, i32
  }
  func.func @transform_5(%arg0: i32, %arg1: i32) -> (i32, i32, i32) {
    %c0_i32 = arith.constant 0 : i32
    %c0_i32_0 = arith.constant 0 : i32
    %c0_i32_1 = arith.constant 0 : i32
    return %arg0, %c0_i32, %c0_i32_0 : i32, i32, i32
  }
  func.func @transform_6(%arg0: i32, %arg1: i32) -> (i32, i32, i32) {
    %c0_i32 = arith.constant 0 : i32
    %c0_i32_0 = arith.constant 0 : i32
    %c0_i32_1 = arith.constant 0 : i32
    return %arg0, %c0_i32, %c0_i32_0 : i32, i32, i32
  }
  func.func @transform_7(%arg0: i32, %arg1: i32) -> (i32, i32) {
    %c0_i32 = arith.constant 0 : i32
    %c0_i32_0 = arith.constant 0 : i32
    %c0_i32_1 = arith.constant 0 : i32
    return %c0_i32, %c0_i32_0 : i32, i32
  }
  func.func @transform_8(%arg0: i32, %arg1: i32) -> (i32, i32) {
    %c0_i32 = arith.constant 0 : i32
    %c0_i32_0 = arith.constant 0 : i32
    %c0_i32_1 = arith.constant 0 : i32
    return %c0_i32, %c0_i32_0 : i32, i32
  }
  func.func @transform_9(%arg0: i32, %arg1: i32) -> (i32, i32) {
    %c0_i32 = arith.constant 0 : i32
    %c0_i32_0 = arith.constant 0 : i32
    %c0_i32_1 = arith.constant 0 : i32
    return %c0_i32, %c0_i32_0 : i32, i32
  }
  func.func @transform_10(%arg0: i32, %arg1: i32) -> (i32, i32) {
    %c0_i32 = arith.constant 0 : i32
    %c0_i32_0 = arith.constant 0 : i32
    %c0_i32_1 = arith.constant 0 : i32
    return %c0_i32, %c0_i32_0 : i32, i32
  }
  func.func @transform_11(%arg0: i32, %arg1: i32) -> (i32, i32) {
    %c0_i32 = arith.constant 0 : i32
    %c0_i32_0 = arith.constant 0 : i32
    %c0_i32_1 = arith.constant 0 : i32
    return %c0_i32, %c0_i32_0 : i32, i32
  }
  func.func @transform_12(%arg0: i32, %arg1: i32) -> (i32, i32) {
    %c0_i32 = arith.constant 0 : i32
    %c0_i32_0 = arith.constant 0 : i32
    %c0_i32_1 = arith.constant 0 : i32
    return %c0_i32, %c0_i32_0 : i32, i32
  }
  func.func @transform_13(%arg0: i32, %arg1: i32) -> (i32, i32) {
    %c0_i32 = arith.constant 0 : i32
    %c0_i32_0 = arith.constant 0 : i32
    %c0_i32_1 = arith.constant 0 : i32
    return %c0_i32, %c0_i32_0 : i32, i32
  }
  func.func @transform_14(%arg0: i32, %arg1: i32) -> (i32, i32) {
    %c0_i32 = arith.constant 0 : i32
    %c0_i32_0 = arith.constant 0 : i32
    %c0_i32_1 = arith.constant 0 : i32
    return %c0_i32, %c0_i32_0 : i32, i32
  }
  func.func @transform_15(%arg0: i32, %arg1: i32) -> (i32, i32) {
    %c0_i32 = arith.constant 0 : i32
    %c0_i32_0 = arith.constant 0 : i32
    %c0_i32_1 = arith.constant 0 : i32
    return %c0_i32, %c0_i32_0 : i32, i32
  }
}

</mosaic_0001>

<bundles_post_ra>
// kernel: tpu_custom_call.1
= control target key start
LH: loop header
LB: loop body
LE: loop exit
PB: predicated region body
PF: predicated region fallthrough
CT: control target
= control target key end

     0   :  { %20 = vsyncpa [#allocation5], 0  ;;  %s2374_s18 = smov 0   ;;  %s2376_s19 = smov 0   ;;  %s2874_s0 = inlined_call_operand.vmem [shape: bf16[128,128], index: 0, kind: input, shape index: {}]   ;;  %s2875_s1 = inlined_call_operand.vmem [shape: bf16[128,32], index: 1, kind: input, shape index: {}]   ;;  %s2876_s2 = inlined_call_operand.vmem [shape: bf16[8,128], index: 2, kind: input, shape index: {}]   ;;  %s2877_s3 = inlined_call_operand.vmem [shape: s32[128,1], index: 3, kind: input, shape index: {}]   ;;  %s2878_s4 = inlined_call_operand.vmem [shape: f32[8,1], index: 4, kind: input, shape index: {}]   ;;  %s2879_s5 = inlined_call_operand.vmem [shape: bf16[3,32,32], index: 5, kind: input, shape index: {}]   ;;  %s2880_s6 = inlined_call_operand.vmem [shape: bf16[3,32,32], index: 6, kind: input, shape index: {}]   ;;  %s2881_s7 = inlined_call_operand.vmem [shape: bf16[32,64], index: 7, kind: input, shape index: {}]   ;;  %s2882_s8 = inlined_call_operand.vmem [shape: bf16[32,64], index: 8, kind: input, shape index: {}]   ;;  %s2883_s9 = inlined_call_operand.vmem [shape: bf16[32,64], index: 9, kind: input, shape index: {}]   ;;  %s2884_s10 = inlined_call_operand.vmem [shape: f32[1,64], index: 10, kind: input, shape index: {}]   ;;  %s2885_s11 = inlined_call_operand.vmem [shape: bf16[64,32], index: 11, kind: input, shape index: {}]   ;;  %s2886_s12 = inlined_call_operand.vmem [shape: f32[1,32], index: 12, kind: input, shape index: {}]   ;;  %s2887_s13 = inlined_call_operand.vmem [shape: bf16[32,128], index: 13, kind: input, shape index: {}]   ;;  %s2888_s14 = inlined_call_operand.vmem [shape: f32[1,128], index: 14, kind: input, shape index: {}]   ;;  %s2889_s15 = inlined_call_operand.hbm [shape: f32[8,128], index: 15, kind: output, shape index: {}]  }
   0x1   :  { %s2378_s20 = smov 0  }
   0x2 LB: > { %s38_s22 = sadd.s32 1, %s2274_s19  ;;  %p1859_p1 = scmp.ge.s32.totalorder %s2278_s20, 1  ;;  %s2278_s20 = sphi %s2378_s20, %s26_s20   ;;  %s2274_s19 = sphi %s2376_s19, %s2905_s19   ;;  %s2270_s18 = sphi %s2374_s18, %s2904_s18  }
   0x3   : > { %p40_p0 = scmp.ge.s32.totalorder %s38_s22, 3  ;;  %p466_p2 = scmp.lt.s32.totalorder %s2278_s20, 4 }
   0x5   : > { %s2907_s22 = smov (%p40_p0, %s38_s22), 0  ;;  %p467_p3 = pnand %p1859_p1, %p466_p2 }
   0x6   : > { %2890 = sst [smem:[#allocation7_spill]] %s2907_s22  ;;  %p525_p4 = scmp.lt.s32.totalorder (!%p467_p3), %s2270_s18, 2 }
   0x7   : > { %470 = sbr.rel (%p467_p3) target bundleno = 1956 (0x7a4), region = 80  ;;  %p536_p5 = scmp.eq.s32.totalorder (!%p467_p3), %s2270_s18, 0 }
   0xe   : > { %s526_s23 = scalar_select %p525_p4, %s2270_s18, 2 }
   0xf   : > { %541 = sbr.rel (!%p536_p5) target bundleno = 24 (0x18), region = 84  ;;  %v2180_v0 = vld [vmem:[%s2875_s1] sm:$0xff] (%p536_p5)   ;;  %vm606_vm0 = vcmask (%p536_p5), 261120   ;;  %v2181_v1 = vld [vmem:[%s2875_s1 + $0x8] sm:$0xff] (%p536_p5)   ;;  %v2182_v2 = vld [vmem:[%s2875_s1 + $0x10] sm:$0xff] (%p536_p5)   ;;  %v2288_v3 = vmov (%p536_p5), 0  }
  0x10   : > { %s1926_s24 = sshll.u32 %s526_s23, 4  ;;  %607 = vst.msk [vmem:[#allocation2] sm:$0xff] (%p536_p5), %vm606_vm0, %v2180_v0  ;;  %615 = vst.msk [vmem:[#allocation3] sm:$0xff] (%p536_p5), %vm606_vm0, %v2288_v3  ;;  %v2183_v4 = vld [vmem:[%s2875_s1 + $0x18] sm:$0xff] (%p536_p5)   ;;  %v2184_v5 = vld [vmem:[%s2875_s1 + $0x20] sm:$0xff] (%p536_p5)  }
  0x11   : > { %s2401_s27 = scalar_lea.vmem %s2879_s5, %s1926_s24  ;;  %s2406_s30 = scalar_lea.vmem %s2880_s6, %s1926_s24  ;;  %616 = vst.msk [vmem:[#allocation3 + $0x8] sm:$0xff] (%p536_p5), %vm606_vm0, %v2288_v3  ;;  %617 = vst.msk [vmem:[#allocation3 + $0x10] sm:$0xff] (%p536_p5), %vm606_vm0, %v2288_v3  ;;  %v2185_v6 = vld [vmem:[%s2875_s1 + $0x28] sm:$0xff] (%p536_p5)   ;;  %v2186_v7 = vld [vmem:[%s2875_s1 + $0x30] sm:$0xff] (%p536_p5)  }
  0x12   : > { %618 = vst.msk [vmem:[#allocation3 + $0x18] sm:$0xff] (%p536_p5), %vm606_vm0, %v2288_v3  ;;  %619 = vst.msk [vmem:[#allocation3 + $0x20] sm:$0xff] (%p536_p5), %vm606_vm0, %v2288_v3  ;;  %v2187_v8 = vld [vmem:[%s2875_s1 + $0x38] sm:$0xff] (%p536_p5)  }
  0x13   : > { %620 = vst.msk [vmem:[#allocation3 + $0x28] sm:$0xff] (%p536_p5), %vm606_vm0, %v2288_v3  ;;  %621 = vst.msk [vmem:[#allocation3 + $0x30] sm:$0xff] (%p536_p5), %vm606_vm0, %v2288_v3 }
  0x14   : > { %622 = vst.msk [vmem:[#allocation3 + $0x38] sm:$0xff] (%p536_p5), %vm606_vm0, %v2288_v3  ;;  %608 = vst.msk [vmem:[#allocation2 + $0x8] sm:$0xff] (%p536_p5), %vm606_vm0, %v2181_v1 }
  0x15   : > { %609 = vst.msk [vmem:[#allocation2 + $0x10] sm:$0xff] (%p536_p5), %vm606_vm0, %v2182_v2  ;;  %610 = vst.msk [vmem:[#allocation2 + $0x18] sm:$0xff] (%p536_p5), %vm606_vm0, %v2183_v4 }
  0x16   : > { %611 = vst.msk [vmem:[#allocation2 + $0x20] sm:$0xff] %vm606_vm0, %v2184_v5  ;;  %612 = vst.msk [vmem:[#allocation2 + $0x28] sm:$0xff] %vm606_vm0, %v2185_v6 }
  0x17   : > { %613 = vst.msk [vmem:[#allocation2 + $0x30] sm:$0xff] %vm606_vm0, %v2186_v7  ;;  %614 = vst.msk [vmem:[#allocation2 + $0x38] sm:$0xff] %vm606_vm0, %v2187_v8 }
  0x18 PF: > { %v2188_v11 = vld [vmem:[%s2874_s0] sm:$0xff]   ;;  %v2189_v19 = vld [vmem:[%s2874_s0 + $0x8] sm:$0xff]   ;;  %v2190_v20 = vld [vmem:[%s2874_s0 + $0x10] sm:$0xff]   ;;  %vm816_vm1 = vcmask 261120   ;;  %p1155_p6 = scmp.eq.s32.totalorder %s2270_s18, 2 }
  0x19   : > { %v639_v9 = vld [vmem:[#allocation2] sm:$0xff]  ;;  %2008 = vmatprep.mubr.bf16.mxu0 %v2188_v11  ;;  %v2191_v21 = vld [vmem:[%s2874_s0 + $0x18] sm:$0xff]   ;;  %v2193_v23 = vld [vmem:[%s2874_s0 + $0x28] sm:$0xff]   ;;  %vm2290_vm2 = vmmov (%p1155_p6), 0   ;;  %s2660_s26 = smov (%p1155_p6), 0  }
  0x1a   : > { %1992 = vmatprep.subr.bf16.mxu0 %v639_v9  ;;  %v2196_v15 = vld [vmem:[%s2401_s27] sm:$0xff]   ;;  %v2194_v24 = vld [vmem:[%s2874_s0 + $0x30] sm:$0xff]   ;;  %v2195_v25 = vld [vmem:[%s2874_s0 + $0x38] sm:$0xff]  }
  0x1b   : > { %1993 = vmatpush3.bf16.msra.mxu0 %v639_v9  ;;  %2024 = vmatprep.subr.bf16.mxu1 %v2196_v15  ;;  %v2192_v22 = vld [vmem:[%s2874_s0 + $0x20] sm:$0xff]   ;;  %v2197_v26 = vld [vmem:[%s2401_s27 + $0x8] sm:$0xff]  }
  0x1c   : > { %2025 = vmatpush3.bf16.msra.mxu1 %v2196_v15  ;;  %v2198_v27 = vld [vmem:[%s2406_s30] sm:$0xff]   ;;  %v2199_v34 = vld [vmem:[%s2406_s30 + $0x8] sm:$0xff]  }
  0x1d   : > { %v640_v10 = vld [vmem:[#allocation2 + $0x8] sm:$0xff]  ;;  %2026 = vmatprep.subr.bf16.mxu1 %v2197_v26 }
  0x1e   : > { %1994 = vmatprep.subr.bf16.mxu0 %v640_v10  ;;  %v641_v12 = vld [vmem:[#allocation2 + $0x10] sm:$0xff]  ;;  %v642_v13 = vld [vmem:[#allocation2 + $0x18] sm:$0xff] }
  0x1f   : > { %1995 = vmatpush3.bf16.msra.mxu0 %v640_v10  ;;  %v643_v14 = vld [vmem:[#allocation2 + $0x20] sm:$0xff]  ;;  %v644_v16 = vld [vmem:[#allocation2 + $0x28] sm:$0xff]  ;;  %v645_v17 = vld [vmem:[#allocation2 + $0x30] sm:$0xff] }
  0x20   : > { %1996 = vmatprep.subr.bf16.mxu0 %v641_v12  ;;  %v646_v18 = vld [vmem:[#allocation2 + $0x38] sm:$0xff]  ;;  %2027 = vmatpush3.bf16.msra.mxu1 %v2197_v26 }
  0x21   : > { %2044 = vmatprep.subr.bf16.mxu1 %v2198_v27 }
  0x23   : > { %1997 = vmatpush3.bf16.msra.mxu0 %v641_v12 }
  0x24   : > { %1998 = vmatprep.subr.bf16.mxu0 %v642_v13 }
  0x27   : > { %1999 = vmatpush3.bf16.msra.mxu0 %v642_v13 }
  0x28   : > { %2000 = vmatprep.subr.bf16.mxu0 %v643_v14 }
  0x2b   : > { %2001 = vmatpush3.bf16.msra.mxu0 %v643_v14 }
  0x2c   : > { %2002 = vmatprep.subr.bf16.mxu0 %v644_v16 }
  0x2f   : > { %2003 = vmatpush3.bf16.msra.mxu0 %v644_v16 }
  0x30   : > { %2004 = vmatprep.subr.bf16.mxu0 %v645_v17 }
  0x33   : > { %2005 = vmatpush3.bf16.msra.mxu0 %v645_v17 }
  0x34   : > { %2006 = vmatprep.subr.bf16.mxu0 %v646_v18 }
  0x37   : > { %2007 = vmatpush3.bf16.msra.mxu0 %v646_v18 }
  0x3a   : > { %2009 = vmatmul.mubr.bf16.vlgmr.msra.gmra.mrb[0].mxu0 %v2189_v19 }
  0x3b   : > { %2012 = vmatprep.mubr.bf16.mxu0 %v2190_v20 }
  0x42   : > { %2013 = vmatmul.mubr.bf16.gmra.mrb[4].mxu0 %v2191_v21 }
  0x43   : > { %2016 = vmatprep.mubr.bf16.mxu0 %v2192_v22 }
  0x4a   : > { %2017 = vmatmul.mubr.bf16.gmra.mrb[8].mxu0 %v2193_v23 }
  0x4b   : > { %2020 = vmatprep.mubr.bf16.mxu0 %v2194_v24 }
  0x52   : > { %2021 = vmatmul.mubr.bf16.gmra.mrb[12].mxu0 %v2195_v25 }
 0x10d   : > { %v2010_v28 = vpop.f32.mrb[0].mxu0 }
 0x10e   : > { %v729_v29 = vpop.f32.mrb[1].mxu0 }
 0x10f   : > { %v2011_v30 = vpop.f32.mrb[2].mxu0 }
 0x110   : > { %v793_v31 = vpack.c.bf16 %v2011_v30, %v2010_v28  ;;  %v732_v32 = vpop.f32.mrb[3].mxu0 }
 0x111   : > { %v792_v33 = vpack.c.bf16 %v732_v32, %v729_v29 }
 0x113   : > { %2028 = vmatprep.mubr.msk.bf16.mxu1 %vm816_vm1, %v792_v33 }
 0x114   : > { %2029 = vmatmul.mubr.msk.bf16.vlgmr.msra.gmra.mrb[0].mxu1 %vm816_vm1, %v793_v31 }
 0x115   : > { %v2014_v35 = vpop.f32.mrb[4].mxu0  ;;  %2045 = vmatpush3.bf16.msra.mxu1 %v2198_v27 }
 0x116   : > { %v745_v36 = vpop.f32.mrb[5].mxu0  ;;  %2046 = vmatprep.subr.bf16.mxu1 %v2199_v34 }
 0x117   : > { %v2015_v37 = vpop.f32.mrb[6].mxu0 }
 0x118   : > { %v795_v38 = vpack.c.bf16 %v2015_v37, %v2014_v35  ;;  %v748_v39 = vpop.f32.mrb[7].mxu0 }
 0x119   : > { %v794_v40 = vpack.c.bf16 %v748_v39, %v745_v36  ;;  %2047 = vmatpush3.bf16.msra.mxu1 %v2199_v34 }
 0x11b   : > { %2032 = vmatprep.mubr.msk.bf16.mxu1 %vm816_vm1, %v794_v40 }
 0x11c   : > { %2033 = vmatmul.mubr.msk.bf16.gmra.mrb[4].mxu1 %vm816_vm1, %v795_v38 }
 0x11d   : > { %v2018_v41 = vpop.f32.mrb[8].mxu0 }
 0x11e   : > { %v761_v42 = vpop.f32.mrb[9].mxu0 }
 0x11f   : > { %v2019_v43 = vpop.f32.mrb[10].mxu0 }
 0x120   : > { %v797_v44 = vpack.c.bf16 %v2019_v43, %v2018_v41  ;;  %v764_v45 = vpop.f32.mrb[11].mxu0 }
 0x121   : > { %v796_v46 = vpack.c.bf16 %v764_v45, %v761_v42 }
 0x123   : > { %2036 = vmatprep.mubr.msk.bf16.mxu1 %vm816_vm1, %v796_v46 }
 0x124   : > { %2037 = vmatmul.mubr.msk.bf16.gmra.mrb[8].mxu1 %vm816_vm1, %v797_v44 }
 0x125   : > { %v2022_v47 = vpop.f32.mrb[12].mxu0 }
 0x126   : > { %v777_v48 = vpop.f32.mrb[13].mxu0 }
 0x127   : > { %v2023_v49 = vpop.f32.mrb[14].mxu0 }
 0x128   : > { %v799_v50 = vpack.c.bf16 %v2023_v49, %v2022_v47  ;;  %v780_v51 = vpop.f32.mrb[15].mxu0 }
 0x129   : > { %v798_v52 = vpack.c.bf16 %v780_v51, %v777_v48 }
 0x12b   : > { %2040 = vmatprep.mubr.msk.bf16.mxu1 %vm816_vm1, %v798_v52 }
 0x12c   : > { %2041 = vmatmul.mubr.msk.bf16.gmra.mrb[12].mxu1 %vm816_vm1, %v799_v50 }
 0x1e7   : > { %v2030_v53 = vpop.f32.mrb[0].mxu1 }
 0x1e8   : > { %v875_v54 = vpop.f32.mrb[1].mxu1  ;;  %v940_v56 = vmax.f32 %v2030_v53, 0.0 }
 0x1e9   : > { %v2031_v55 = vpop.f32.mrb[2].mxu1  ;;  %v938_v59 = vmax.f32 %v875_v54, 0.0 }
 0x1ea   : > { %v941_v57 = vmax.f32 %v2031_v55, 0.0  ;;  %v878_v58 = vpop.f32.mrb[3].mxu1 }
 0x1eb   : > { %v939_v60 = vmax.f32 %v878_v58, 0.0 }
 0x1ec   : > { %v955_v61 = vpack.c.bf16 %v941_v57, %v940_v56 }
 0x1ed   : > { %v954_v62 = vpack.c.bf16 %v939_v60, %v938_v59 }
 0x1ef   : > { %v2034_v63 = vpop.f32.mrb[4].mxu1  ;;  %2048 = vmatprep.mubr.msk.bf16.mxu1 %vm816_vm1, %v954_v62 }
 0x1f0   : > { %v891_v0 = vpop.f32.mrb[5].mxu1  ;;  %2049 = vmatmul.mubr.msk.bf16.vlgmr.msra.gmra.mrb[16].mxu1 %vm816_vm1, %v955_v61  ;;  %v944_v2 = vmax.f32 %v2034_v63, 0.0 }
 0x1f1   : > { %v2035_v1 = vpop.f32.mrb[6].mxu1  ;;  %v942_v5 = vmax.f32 %v891_v0, 0.0 }
 0x1f2   : > { %v945_v3 = vmax.f32 %v2035_v1, 0.0  ;;  %v894_v4 = vpop.f32.mrb[7].mxu1 }
 0x1f3   : > { %v943_v6 = vmax.f32 %v894_v4, 0.0 }
 0x1f4   : > { %v957_v7 = vpack.c.bf16 %v945_v3, %v944_v2 }
 0x1f5   : > { %v956_v8 = vpack.c.bf16 %v943_v6, %v942_v5 }
 0x1f7   : > { %v2038_v9 = vpop.f32.mrb[8].mxu1  ;;  %2052 = vmatprep.mubr.msk.bf16.mxu1 %vm816_vm1, %v956_v8 }
 0x1f8   : > { %v907_v10 = vpop.f32.mrb[9].mxu1  ;;  %2053 = vmatmul.mubr.msk.bf16.gmra.mrb[20].mxu1 %vm816_vm1, %v957_v7  ;;  %v948_v12 = vmax.f32 %v2038_v9, 0.0 }
 0x1f9   : > { %v2039_v11 = vpop.f32.mrb[10].mxu1  ;;  %v946_v15 = vmax.f32 %v907_v10, 0.0 }
 0x1fa   : > { %v949_v13 = vmax.f32 %v2039_v11, 0.0  ;;  %v910_v14 = vpop.f32.mrb[11].mxu1 }
 0x1fb   : > { %v947_v16 = vmax.f32 %v910_v14, 0.0 }
 0x1fc   : > { %v959_v17 = vpack.c.bf16 %v949_v13, %v948_v12 }
 0x1fd   : > { %v958_v18 = vpack.c.bf16 %v947_v16, %v946_v15  ;;  %v2289_v15 = vmov (%p1155_p6), 0.0  }
 0x1fe   : > { %2064 = vmatprep.subr.bf16.mxu0 (%p1155_p6), %v2289_v15  ;;  %2080 = vmatprep.mubr.msk.bf16.mxu0 (%p1155_p6), %vm2290_vm2, %v2289_v15 }
 0x1ff   : > { %v2042_v19 = vpop.f32.mrb[12].mxu1  ;;  %2056 = vmatprep.mubr.msk.bf16.mxu1 %vm816_vm1, %v958_v18 }
 0x200   : > { %v923_v20 = vpop.f32.mrb[13].mxu1  ;;  %2057 = vmatmul.mubr.msk.bf16.gmra.mrb[24].mxu1 %vm816_vm1, %v959_v17  ;;  %v952_v22 = vmax.f32 %v2042_v19, 0.0 }
 0x201   : > { %v2043_v21 = vpop.f32.mrb[14].mxu1  ;;  %v950_v25 = vmax.f32 %v923_v20, 0.0 }
 0x202   : > { %v953_v23 = vmax.f32 %v2043_v21, 0.0  ;;  %v926_v24 = vpop.f32.mrb[15].mxu1 }
 0x203   : > { %v951_v26 = vmax.f32 %v926_v24, 0.0 }
 0x204   : > { %v961_v27 = vpack.c.bf16 %v953_v23, %v952_v22 }
 0x205   : > { %v960_v28 = vpack.c.bf16 %v951_v26, %v950_v25 }
 0x207   : > { %2060 = vmatprep.mubr.msk.bf16.mxu1 %vm816_vm1, %v960_v28  ;;  %v2291_v28 = vmov (%p1155_p6), 0  }
 0x208   : > { %2061 = vmatmul.mubr.msk.bf16.gmra.mrb[28].mxu1 %vm816_vm1, %v961_v27  ;;  %2200 = vset.pattern.permute.xlu0 (%p1155_p6), %v2291_v28 }
 0x2c3   : > { %v2050_v29 = vpop.f32.mrb[16].mxu1 }
 0x2c4   : > { %v1036_v30 = vpop.f32.mrb[17].mxu1  ;;  %v1101_v32 = vmax.f32 %v2050_v29, 0.0 }
 0x2c5   : > { %v2051_v31 = vpop.f32.mrb[18].mxu1  ;;  %v1099_v35 = vmax.f32 %v1036_v30, 0.0 }
 0x2c6   : > { %v1102_v33 = vmax.f32 %v2051_v31, 0.0  ;;  %v1039_v34 = vpop.f32.mrb[19].mxu1 }
 0x2c7   : > { %v1100_v36 = vmax.f32 %v1039_v34, 0.0 }
 0x2c8   : > { %v1116_v37 = vpack.c.bf16 %v1102_v33, %v1101_v32 }
 0x2c9   : > { %v1115_v38 = vpack.c.bf16 %v1100_v36, %v1099_v35  ;;  %v2548_v35 = vld [vmem:[%s2878_s4] sm:$0xff] (%p1155_p6) }
 0x2ca   : > { %1129 = vst.msk [vmem:[#allocation3 + $0x8] sm:$0xff] %vm816_vm1, %v1116_v37 }
 0x2cb   : > { %1128 = vst.msk [vmem:[#allocation3] sm:$0xff] %vm816_vm1, %v1115_v38  ;;  %v2054_v39 = vpop.f32.mrb[20].mxu1 }
 0x2cc   : > { %v1052_v40 = vpop.f32.mrb[21].mxu1  ;;  %v1105_v42 = vmax.f32 %v2054_v39, 0.0 }
 0x2cd   : > { %v2055_v41 = vpop.f32.mrb[22].mxu1  ;;  %v1103_v45 = vmax.f32 %v1052_v40, 0.0  ;;  %v1210_v40 = vmax.f32 (%p1155_p6), %v2548_v35, 1.0 }
 0x2ce   : > { %v1106_v43 = vmax.f32 %v2055_v41, 0.0  ;;  %v1055_v44 = vpop.f32.mrb[23].mxu1  ;;  %v1169_v41 = vld [vmem:[%s2876_s2] sm:$0xf] (%p1155_p6) }
 0x2cf   : > { %v1104_v46 = vmax.f32 %v1055_v44, 0.0  ;;  %1213 = vperm.xlu0 (%p1155_p6), %2200, %v1210_v40   ;;  %v2579_v44 = vld [vmem:[%s2877_s3 + $0x8] sm:$0xff] (%p1155_p6) }
 0x2d0   : > { %v1118_v47 = vpack.c.bf16 %v1106_v43, %v1105_v42  ;;  %v1250_v42 = vlaneseq (%p1155_p6)  ;;  %v2574_v43 = vld [vmem:[%s2877_s3] sm:$0xff] (%p1155_p6) }
 0x2d1   : > { %v1140_v48 = vld [vmem:[#allocation3 + $0x8] sm:$0xff]  ;;  %v1117_v49 = vpack.c.bf16 %v1104_v46, %v1103_v45  ;;  %v2584_v45 = vld [vmem:[%s2877_s3 + $0x10] sm:$0xff] (%p1155_p6) }
 0x2d2   : > { %1148 = vst.msk [vmem:[#allocation2 + $0x8] sm:$0xff] %vm816_vm1, %v1140_v48  ;;  %v1139_v50 = vld [vmem:[#allocation3] sm:$0xff]  ;;  %1131 = vst.msk [vmem:[#allocation3 + $0x18] sm:$0xff] %vm816_vm1, %v1118_v47  ;;  %v2586_v46 = vshrl.u32 (%p1155_p6), %v1250_v42, 7  ;;  %v2591_v47 = vld [vmem:[%s2877_s3 + $0x18] sm:$0xff] (%p1155_p6) }
 0x2d3   : > { %1147 = vst.msk [vmem:[#allocation2] sm:$0xff] %vm816_vm1, %v1139_v50  ;;  %1130 = vst.msk [vmem:[#allocation3 + $0x10] sm:$0xff] %vm816_vm1, %v1117_v49  ;;  %v2058_v51 = vpop.f32.mrb[24].mxu1  ;;  %v2596_v48 = vld [vmem:[%s2877_s3 + $0x20] sm:$0xff] (%p1155_p6)  ;;  %v2601_v49 = vld [vmem:[%s2877_s3 + $0x28] sm:$0xff] (%p1155_p6) }
 0x2d4   : > { %v1068_v52 = vpop.f32.mrb[25].mxu1  ;;  %v1109_v54 = vmax.f32 %v2058_v51, 0.0  ;;  %v2606_v50 = vld [vmem:[%s2877_s3 + $0x30] sm:$0xff] (%p1155_p6)  ;;  %v2611_v51 = vld [vmem:[%s2877_s3 + $0x38] sm:$0xff] (%p1155_p6) }
 0x2d5   : > { %v2059_v53 = vpop.f32.mrb[26].mxu1  ;;  %v1107_v57 = vmax.f32 %v1068_v52, 0.0  ;;  %v2616_v52 = vld [vmem:[%s2877_s3 + $0x40] sm:$0xff] (%p1155_p6) }
 0x2d6   : > { %v1110_v55 = vmax.f32 %v2059_v53, 0.0  ;;  %v1071_v56 = vpop.f32.mrb[27].mxu1  ;;  %v2621_v53 = vld [vmem:[%s2877_s3 + $0x48] sm:$0xff] (%p1155_p6) }
 0x2d7   : > { %v1108_v58 = vmax.f32 %v1071_v56, 0.0  ;;  %v2636_v56 = vld [vmem:[%s2877_s3 + $0x60] sm:$0xff] (%p1155_p6) }
 0x2d8   : > { %v1120_v59 = vpack.c.bf16 %v1110_v55, %v1109_v54  ;;  %v2626_v54 = vld [vmem:[%s2877_s3 + $0x50] sm:$0xff] (%p1155_p6)  ;;  %v2631_v55 = vld [vmem:[%s2877_s3 + $0x58] sm:$0xff] (%p1155_p6) }
 0x2d9   : > { %v1142_v60 = vld [vmem:[#allocation3 + $0x18] sm:$0xff]  ;;  %v1119_v61 = vpack.c.bf16 %v1108_v58, %v1107_v57  ;;  %v2513_v14 = vld [vmem:[#allocation2 + $0x8] sm:$0xff] (%p1155_p6)  ;;  %v2646_v58 = vld [vmem:[%s2877_s3 + $0x70] sm:$0xff] (%p1155_p6) }
 0x2da   : > { %1150 = vst.msk [vmem:[#allocation2 + $0x18] sm:$0xff] %vm816_vm1, %v1142_v60  ;;  %v1141_v62 = vld [vmem:[#allocation3 + $0x10] sm:$0xff]  ;;  %1133 = vst.msk [vmem:[#allocation3 + $0x28] sm:$0xff] %vm816_vm1, %v1120_v59  ;;  %v2511_v13 = vld [vmem:[#allocation2] sm:$0xff] (%p1155_p6) }
 0x2db   : > { %1149 = vst.msk [vmem:[#allocation2 + $0x10] sm:$0xff] %vm816_vm1, %v1141_v62  ;;  %1132 = vst.msk [vmem:[#allocation3 + $0x20] sm:$0xff] %vm816_vm1, %v1119_v61  ;;  %v2062_v63 = vpop.f32.mrb[28].mxu1  ;;  %2065 = vmatpush3.bf16.msra.mxu0 (%p1155_p6), %v2511_v13  ;;  %v2641_v57 = vld [vmem:[%s2877_s3 + $0x68] sm:$0xff] (%p1155_p6)  ;;  %v2651_v59 = vld [vmem:[%s2877_s3 + $0x78] sm:$0xff] (%p1155_p6) }
 0x2dc   : > { %v1084_v0 = vpop.f32.mrb[29].mxu1  ;;  %v1113_v2 = vmax.f32 %v2062_v63, 0.0  ;;  %2066 = vmatprep.subr.bf16.mxu0 (%p1155_p6), %v2289_v15 }
 0x2dd   : > { %v2063_v1 = vpop.f32.mrb[30].mxu1  ;;  %v1111_v5 = vmax.f32 %v1084_v0, 0.0 }
 0x2de   : > { %v1114_v3 = vmax.f32 %v2063_v1, 0.0  ;;  %v1087_v4 = vpop.f32.mrb[31].mxu1 }
 0x2df   : > { %v1112_v6 = vmax.f32 %v1087_v4, 0.0  ;;  %2067 = vmatpush3.bf16.msra.mxu0 (%p1155_p6), %v2513_v14 }
 0x2e0   : > { %v1122_v7 = vpack.c.bf16 %v1114_v3, %v1113_v2  ;;  %2068 = vmatprep.subr.bf16.mxu0 (%p1155_p6), %v2289_v15  ;;  %v2658_v3 = vmov (%p1155_p6), -inf  }
 0x2e1   : > { %v1144_v8 = vld [vmem:[#allocation3 + $0x28] sm:$0xff]  ;;  %v1121_v9 = vpack.c.bf16 %v1112_v6, %v1111_v5  ;;  %v2522_v21 = vld [vmem:[#allocation2 + $0x18] sm:$0xff] (%p1155_p6) }
 0x2e2   : > { %1152 = vst.msk [vmem:[#allocation2 + $0x28] sm:$0xff] %vm816_vm1, %v1144_v8  ;;  %v1143_v10 = vld [vmem:[#allocation3 + $0x20] sm:$0xff]  ;;  %1135 = vst.msk [vmem:[#allocation3 + $0x38] sm:$0xff] %vm816_vm1, %v1122_v7  ;;  %v2520_v20 = vld [vmem:[#allocation2 + $0x10] sm:$0xff] (%p1155_p6) }
 0x2e3   : > { %1151 = vst.msk [vmem:[#allocation2 + $0x20] sm:$0xff] %vm816_vm1, %v1143_v10  ;;  %1134 = vst.msk [vmem:[#allocation3 + $0x30] sm:$0xff] %vm816_vm1, %v1121_v9  ;;  %2069 = vmatpush3.bf16.msra.mxu0 (%p1155_p6), %v2520_v20 }
 0x2e4   : > { %2070 = vmatprep.subr.bf16.mxu0 (%p1155_p6), %v2289_v15 }
 0x2e5   : > { %1159 = sbr.rel (!%p1155_p6) target bundleno = 1931 (0x78b), region = 92 }
 0x2e7   : > { %2071 = vmatpush3.bf16.msra.mxu0 (%p1155_p6), %v2522_v21 }
 0x2e8   : > { %2072 = vmatprep.subr.bf16.mxu0 (%p1155_p6), %v2289_v15 }
 0x2e9   : > { %v1146_v11 = vld [vmem:[#allocation3 + $0x38] sm:$0xff]  ;;  %v2533_v27 = vld [vmem:[#allocation2 + $0x28] sm:$0xff] (%p1155_p6) }
 0x2ea   : > { %1154 = vst.msk [vmem:[#allocation2 + $0x38] sm:$0xff] %vm816_vm1, %v1146_v11  ;;  %v1145_v12 = vld [vmem:[#allocation3 + $0x30] sm:$0xff]  ;;  %v2531_v26 = vld [vmem:[#allocation2 + $0x20] sm:$0xff] (%p1155_p6)  ;;  %v1228_v31 = vunpack.c.l.bf16 (%p1155_p6), %v2533_v27  ;;  %v1229_v32 = vunpack.c.h.bf16 (%p1155_p6), %v2533_v27 }
 0x2eb   : > { %1153 = vst.msk [vmem:[#allocation2 + $0x30] sm:$0xff] %vm816_vm1, %v1145_v12  ;;  %v1227_v30 = vunpack.c.h.bf16 (%p1155_p6), %v2531_v26  ;;  %2073 = vmatpush3.bf16.msra.mxu0 (%p1155_p6), %v2531_v26 }
 0x2ec   : > { %2074 = vmatprep.subr.bf16.mxu0 %v2289_v15 }
 0x2ef   : > { %2075 = vmatpush3.bf16.msra.mxu0 %v2533_v27 }
 0x2f0   : > { %2076 = vmatprep.subr.bf16.mxu0 %v2289_v15 }
 0x2f1   : > { %v2543_v34 = vld [vmem:[#allocation2 + $0x38] sm:$0xff] }
 0x2f2   : > { %v2541_v33 = vld [vmem:[#allocation2 + $0x30] sm:$0xff]  ;;  %v1232_v38 = vunpack.c.l.bf16 %v2543_v34  ;;  %v1233_v39 = vunpack.c.h.bf16 %v2543_v34 }
 0x2f3   : > { %v1230_v36 = vunpack.c.l.bf16 %v2541_v33  ;;  %v1231_v37 = vunpack.c.h.bf16 %v2541_v33  ;;  %2077 = vmatpush3.bf16.msra.mxu0 %v2541_v33 }
 0x2f4   : > { %2078 = vmatprep.subr.bf16.mxu0 %v2289_v15 }
 0x2f7   : > { %2079 = vmatpush3.bf16.msra.mxu0 %v2543_v34 }
 0x2fa   : > { %2081 = vmatmul.mubr.bf16.vlgmr.msra.gmra.mrb[0].mxu0 %v1169_v41 }
 0x34e   : > { %v1214_v60 = vpop.permute.xlu0 %1213 }
 0x34f   : > { %2201 = vrcp.f32 %v1214_v60 }
 0x359   : > { %v2202_v61 = vpop.eup %2201 }
 0x3cd   : > { %v2653_v62 = vpop.f32.mrb[0].mxu0 }
 0x3ce   : > { %v2656_v63 = vmul.f32 %v2202_v61, %v2653_v62  ;;  %v2082_v0 = vpop.f32.mrb[1].mxu0 }
 0x3cf   : > { %v1207_v1 = vpop.f32.mrb[2].mxu0 }
 0x3d0   : > { %v2083_v2 = vpop.f32.mrb[3].mxu0 }
 0x3d1 LB: >> { %v2292_v4 = vmov 0   ;;  %v2669_v5 = vstv %s2286_s26  ;;  %v2891_v23 = vunpack.c.h.bf16 %v2520_v20  ;;  %v2892_v22 = vunpack.c.l.bf16 %v2520_v20  ;;  %s1257_s26 = sadd.s32 1, %s2286_s26   ;;  %s2286_s26 = sphi %s2660_s26, %s1257_s26   ;;  %v2282_v3 = vphi %v2658_v3, %v2900_v3  }
 0x3d2   : >> { %2204 = vset.pattern.permute.xlu1 %v2292_v4  ;;  %2203 = vset.pattern.permute.xlu0 %v2292_v4  ;;  %vm1262_vm3 = vcmp.eq.s32.totalorder %v2584_v45, %v2669_v5  ;;  %vm1260_vm4 = vcmp.eq.s32.totalorder %v2574_v43, %v2669_v5  ;;  %vm1263_vm5 = vcmp.eq.s32.totalorder %v2591_v47, %v2669_v5  ;;  %v2893_v18 = vunpack.c.l.bf16 %v2513_v14  ;;  %p1254_p7 = scmp.ge.s32.totalorder %s1257_s26, 8  }
 0x3d3   : >> { %vm1261_vm6 = vcmp.eq.s32.totalorder %v2579_v44, %v2669_v5  ;;  %v1278_v6 = vsel %vm1262_vm3, 1, %v2292_v4  ;;  %v1276_v7 = vsel %vm1260_vm4, 1, %v2292_v4  ;;  %v1279_v8 = vsel %vm1263_vm5, 1, %v2292_v4  ;;  %2084 = vmatprep.subr.bf16.mxu1 (%p1254_p7), %v2289_v15  ;;  %2088 = vmatprep.mubr.msk.bf16.mxu1 (%p1254_p7), %vm2290_vm2, %v2289_v15  ;;  %v2208_v20 = vld [vmem:[%s2881_s7] sm:$0xff] (%p1254_p7)   ;;  %v2213_v34 = vld [vmem:[%s2885_s11 + $0x8] sm:$0xff] (%p1254_p7)  }
 0x3d4   : >> { %1299 = vperm.xlu1 %2204, %v1278_v6   ;;  %1293 = vperm.xlu0 %2203, %v1276_v7   ;;  %v1277_v9 = vsel %vm1261_vm6, 1, %v2292_v4  ;;  %vm1265_vm7 = vcmp.eq.s32.totalorder %v2601_v49, %v2669_v5  ;;  %vm1264_vm8 = vcmp.eq.s32.totalorder %v2596_v48, %v2669_v5  ;;  %vm1267_vm9 = vcmp.eq.s32.totalorder %v2611_v51, %v2669_v5  ;;  %v1911_v49 = vld [vmem:[%s2884_s10] ss:$0 sm:$0xff] (%p1254_p7) }
 0x3d5   : >> { %v1281_v10 = vsel %vm1265_vm7, 1, %v2292_v4  ;;  %v1280_v11 = vsel %vm1264_vm8, 1, %v2292_v4  ;;  %vm1266_vm10 = vcmp.eq.s32.totalorder %v2606_v50, %v2669_v5  ;;  %v1283_v12 = vsel %vm1267_vm9, 1, %v2292_v4  ;;  %2120 = vmatprep.subr.bf16.mxu0 (%p1254_p7), %v2289_v15  ;;  %2124 = vmatprep.mubr.msk.bf16.mxu0 (%p1254_p7), %vm2290_vm2, %v2289_v15 }
 0x3d6   : >> { %v1282_v40 = vsel %vm1266_vm10, 1, %v2292_v4  ;;  %vm1269_vm11 = vcmp.eq.s32.totalorder %v2621_v53, %v2669_v5  ;;  %vm1268_vm12 = vcmp.eq.s32.totalorder %v2616_v52, %v2669_v5  ;;  %vm1271_vm13 = vcmp.eq.s32.totalorder %v2631_v55, %v2669_v5 }
 0x3d7   : >> { %v1285_v41 = vsel %vm1269_vm11, 1, %v2292_v4  ;;  %v1284_v42 = vsel %vm1268_vm12, 1, %v2292_v4  ;;  %vm1270_vm14 = vcmp.eq.s32.totalorder %v2626_v54, %v2669_v5  ;;  %v1287_v60 = vsel %vm1271_vm13, 1, %v2292_v4 }
 0x3d8   : >> { %1302 = vperm.xlu1 %2204, %v1279_v8   ;;  %1296 = vperm.xlu0 %2203, %v1277_v9   ;;  %v1286_v61 = vsel %vm1270_vm14, 1, %v2292_v4  ;;  %vm1273_vm15 = vcmp.eq.s32.totalorder %v2641_v57, %v2669_v5  ;;  %vm1272_vm0 = vcmp.eq.s32.totalorder %v2636_v56, %v2669_v5  ;;  %vm1275_vm3 = vcmp.eq.s32.totalorder %v2651_v59, %v2669_v5  ;;  %v2216_v57 = vld [vmem:[%s2887_s13] sm:$0xff] (%p1254_p7)  }
 0x3d9   : >> { %v1289_v0 = vsel %vm1273_vm15, 1, %v2292_v4  ;;  %v1288_v1 = vsel %vm1272_vm0, 1, %v2292_v4  ;;  %vm1274_vm4 = vcmp.eq.s32.totalorder %v2646_v58, %v2669_v5  ;;  %v1291_v2 = vsel %vm1275_vm3, 1, %v2292_v4  ;;  %2121 = vmatpush3.bf16.msra.mxu0 (%p1254_p7), %v2216_v57  ;;  %v2217_v58 = vld [vmem:[%s2887_s13 + $0x8] sm:$0xff] (%p1254_p7)   ;;  %v1912_v59 = vld [vmem:[%s2886_s12] ss:$0 sm:$0xff] (%p1254_p7) }
 0x3da   : >> { %v1290_v6 = vsel %vm1274_vm4, 1, %v2292_v4  ;;  %v2894_v16 = vunpack.c.l.bf16 %v2511_v13  ;;  %v2895_v19 = vunpack.c.h.bf16 %v2513_v14  ;;  %v2896_v17 = vunpack.c.h.bf16 %v2511_v13  ;;  %v2207_v13 = vld [vmem:[%s2882_s8 + $0x8] sm:$0xff] (%p1254_p7)   ;;  %2122 = vmatprep.subr.bf16.mxu0 (%p1254_p7), %v2289_v15 }
 0x3db   : >> { %v2897_v25 = vunpack.c.h.bf16 %v2522_v21  ;;  %v2898_v24 = vunpack.c.l.bf16 %v2522_v21  ;;  %v2899_v29 = vunpack.c.l.bf16 %v2531_v26  ;;  %v1425_v14 = vpack.c.bf16 (%p1254_p7), %v2656_v63, %v2656_v63  ;;  %v2209_v21 = vld [vmem:[%s2881_s7 + $0x8] sm:$0xff] (%p1254_p7)  }
 0x3dc   : >> { %1308 = vperm.xlu1 %2204, %v1281_v10   ;;  %1305 = vperm.xlu0 %2203, %v1280_v11  }
 0x3dd   : > { %2123 = vmatpush3.bf16.msra.mxu0 (%p1254_p7), %v2217_v58 }
 0x3e0   : >> { %1314 = vperm.xlu1 %2204, %v1283_v12   ;;  %1311 = vperm.xlu0 %2203, %v1282_v40  }
 0x3e4   : >> { %1320 = vperm.xlu1 %2204, %v1285_v41   ;;  %1317 = vperm.xlu0 %2203, %v1284_v42  }
 0x3e8   : >> { %1326 = vperm.xlu1 %2204, %v1287_v60   ;;  %1323 = vperm.xlu0 %2203, %v1286_v61  }
 0x3ec   : >> { %1332 = vperm.xlu1 %2204, %v1289_v0   ;;  %1329 = vperm.xlu0 %2203, %v1288_v1  }
 0x3f0   : >> { %1338 = vperm.xlu1 %2204, %v1291_v2   ;;  %1335 = vperm.xlu0 %2203, %v1290_v6  }
 0x3f4   : > { %2205 = vset.pattern.permute.xlu0 (%p1254_p7), %v2291_v28 }
 0x453   : >> { %v1300_v7 = vpop.permute.xlu1 %1299  ;;  %v1294_v8 = vpop.permute.xlu0 %1293 }
 0x454   : >> { %vm1342_vm7 = vcmp.eq.s32.totalorder %v1300_v7, 1  ;;  %vm1340_vm8 = vcmp.eq.s32.totalorder %v1294_v8, 1 }
 0x455   : >> { %v1358_v0 = vsel %vm1342_vm7, %v2893_v18, -inf  ;;  %v1356_v1 = vsel %vm1340_vm8, %v2894_v16, -inf  ;;  %vm1409_vm7 = vcmp.eq.s32.totalorder %v2586_v46, %v2669_v5  ;;  %vm1413_vm8 = vcmp.gt.f32.partialorder (%p1254_p7), %v2548_v35, 0.0 }
 0x457   : >> { %v1303_v9 = vpop.permute.xlu1 %1302  ;;  %v1297_v10 = vpop.permute.xlu0 %1296 }
 0x458   : >> { %vm1343_vm9 = vcmp.eq.s32.totalorder %v1303_v9, 1  ;;  %vm1341_vm10 = vcmp.eq.s32.totalorder %v1297_v10, 1 }
 0x459   : >> { %v1359_v2 = vsel %vm1343_vm9, %v2895_v19, -inf  ;;  %v1357_v6 = vsel %vm1341_vm10, %v2896_v17, -inf }
 0x45b   : >> { %v1309_v11 = vpop.permute.xlu1 %1308  ;;  %v1306_v12 = vpop.permute.xlu0 %1305 }
 0x45c   : >> { %vm1345_vm5 = vcmp.eq.s32.totalorder %v1309_v11, 1  ;;  %vm1344_vm6 = vcmp.eq.s32.totalorder %v1306_v12, 1 }
 0x45d   : >> { %v1361_v4 = vsel %vm1345_vm5, %v2891_v23, -inf  ;;  %v1360_v61 = vsel %vm1344_vm6, %v2892_v22, -inf }
 0x45e   : >> { %v1378_v7 = vsel %vm816_vm1, %v1361_v4, -inf  ;;  %v1376_v8 = vsel %vm816_vm1, %v1360_v61, -inf  ;;  %v1375_v4 = vsel %vm816_vm1, %v1359_v2, -inf  ;;  %v1373_v61 = vsel %vm816_vm1, %v1357_v6, -inf }
 0x45f   : >> { %v1315_v40 = vpop.permute.xlu1 %1314  ;;  %v1312_v41 = vpop.permute.xlu0 %1311 }
 0x460   : >> { %vm1347_vm11 = vcmp.eq.s32.totalorder %v1315_v40, 1  ;;  %vm1346_vm12 = vcmp.eq.s32.totalorder %v1312_v41, 1  ;;  %v1374_v40 = vsel %vm816_vm1, %v1358_v0, -inf  ;;  %v1372_v41 = vsel %vm816_vm1, %v1356_v1, -inf }
 0x461   : >> { %v1363_v11 = vsel %vm1347_vm11, %v2897_v25, -inf  ;;  %v1362_v12 = vsel %vm1346_vm12, %v2898_v24, -inf  ;;  %v1377_v0 = vmax.f32 %v1372_v41, %v1376_v8 }
 0x462   : >> { %v1382_v1 = vsel %vm816_vm1, %v1363_v11, -inf  ;;  %v1380_v17 = vsel %vm816_vm1, %v1362_v12, -inf }
 0x463   : >> { %v1321_v42 = vpop.permute.xlu1 %1320  ;;  %v1318_v60 = vpop.permute.xlu0 %1317  ;;  %v1383_v11 = vmax.f32 %v1375_v4, %v1382_v1  ;;  %v1381_v12 = vmax.f32 %v1374_v40, %v1380_v17 }
 0x464   : >> { %vm1349_vm13 = vcmp.eq.s32.totalorder %v1321_v42, 1  ;;  %vm1348_vm14 = vcmp.eq.s32.totalorder %v1318_v60, 1 }
 0x465   : >> { %v1365_v42 = vsel %vm1349_vm13, %v1227_v30, -inf  ;;  %v1364_v60 = vsel %vm1348_vm14, %v2899_v29, -inf  ;;  %v2211_v30 = vld [vmem:[%s2883_s9 + $0x8] sm:$0xff] (%p1254_p7)  }
 0x466   : >> { %v1386_v22 = vsel %vm816_vm1, %v1365_v42, -inf  ;;  %v1384_v2 = vsel %vm816_vm1, %v1364_v60, -inf }
 0x467   : >> { %v1327_v9 = vpop.permute.xlu1 %1326  ;;  %v1324_v10 = vpop.permute.xlu0 %1323  ;;  %v1385_v60 = vmax.f32 %v1377_v0, %v1384_v2 }
 0x468   : >> { %vm1351_vm15 = vcmp.eq.s32.totalorder %v1327_v9, 1  ;;  %vm1350_vm0 = vcmp.eq.s32.totalorder %v1324_v10, 1  ;;  %v1379_v10 = vmax.f32 %v1373_v61, %v1378_v7 }
 0x469   : >> { %v1367_v16 = vsel %vm1351_vm15, %v1229_v32, -inf  ;;  %v1366_v9 = vsel %vm1350_vm0, %v1228_v31, -inf  ;;  %v1540_v31 = vpack.c.bf16 (%p1254_p7), %v2653_v62, %v2653_v62  ;;  %v2212_v32 = vld [vmem:[%s2885_s11] sm:$0xff] (%p1254_p7)  }
 0x46a   : >> { %v1390_v6 = vsel %vm816_vm1, %v1367_v16, -inf  ;;  %v1388_v23 = vsel %vm816_vm1, %v1366_v9, -inf  ;;  %v1387_v61 = vmax.f32 %v1379_v10, %v1386_v22 }
 0x46b   : >> { %v1333_v18 = vpop.permute.xlu1 %1332  ;;  %v1330_v19 = vpop.permute.xlu0 %1329  ;;  %v1391_v24 = vmax.f32 %v1383_v11, %v1390_v6  ;;  %v1389_v16 = vmax.f32 %v1381_v12, %v1388_v23 }
 0x46c   : >> { %vm1353_vm3 = vcmp.eq.s32.totalorder %v1333_v18, 1  ;;  %vm1352_vm4 = vcmp.eq.s32.totalorder %v1330_v19, 1 }
 0x46d   : >> { %v1369_v7 = vsel %vm1353_vm3, %v1231_v37, -inf  ;;  %v1368_v8 = vsel %vm1352_vm4, %v1230_v36, -inf }
 0x46e   : >> { %v1394_v41 = vsel %vm816_vm1, %v1369_v7, -inf  ;;  %v1392_v42 = vsel %vm816_vm1, %v1368_v8, -inf }
 0x46f   : >> { %v1339_v18 = vpop.permute.xlu1 %1338  ;;  %v1336_v19 = vpop.permute.xlu0 %1335  ;;  %v1395_v9 = vmax.f32 %v1387_v61, %v1394_v41  ;;  %v1393_v25 = vmax.f32 %v1385_v60, %v1392_v42 }
 0x470   : >> { %vm1355_vm5 = vcmp.eq.s32.totalorder %v1339_v18, 1  ;;  %vm1354_vm6 = vcmp.eq.s32.totalorder %v1336_v19, 1 }
 0x471   : >> { %v1371_v29 = vsel %vm1355_vm5, %v1233_v39, -inf  ;;  %v1370_v17 = vsel %vm1354_vm6, %v1232_v38, -inf  ;;  %v1400_v0 = vmax.f32 %v1393_v25, %v1395_v9  ;;  %v1414_v25 = vsel (%p1254_p7), %vm1413_vm8, 1, %v2291_v28  ;;  %v2210_v28 = vld [vmem:[%s2883_s9] sm:$0xff] (%p1254_p7)   ;;  %v2214_v38 = vld [vmem:[%s2885_s11 + $0x10] sm:$0xff] (%p1254_p7)   ;;  %v2215_v39 = vld [vmem:[%s2885_s11 + $0x18] sm:$0xff] (%p1254_p7)  }
 0x472   : >> { %v1398_v40 = vsel %vm816_vm1, %v1371_v29, -inf  ;;  %v1396_v4 = vsel %vm816_vm1, %v1370_v17, -inf  ;;  %1416 = vperm.xlu0 (%p1254_p7), %2205, %v1414_v25  }
 0x473   : >> { %v1399_v22 = vmax.f32 %v1391_v24, %v1398_v40  ;;  %v1397_v10 = vmax.f32 %v1389_v16, %v1396_v4  ;;  %v2206_v24 = vld [vmem:[%s2882_s8] sm:$0xff] (%p1254_p7)  }
 0x474   : > { %2085 = vmatpush3.bf16.msra.mxu1 (%p1254_p7), %v2206_v24 }
 0x475   : >> { %v1401_v1 = vmax.f32 %v1397_v10, %v1399_v22  ;;  %2086 = vmatprep.subr.bf16.mxu1 (%p1254_p7), %v2289_v15 }
 0x477   : >> { %v1402_v2 = vmax.f32 %v1400_v0, %v1401_v1 }
 0x478   : > { %2087 = vmatpush3.bf16.msra.mxu1 (%p1254_p7), %v2207_v13 }
 0x479   : >> { %v1403_v23 = vrot.slane %v1402_v2, 4  ;;  %2092 = vmatprep.subr.bf16.mxu1 (%p1254_p7), %v2289_v15 }
 0x47b   : >> { %v1404_v6 = vmax.f32 %v1402_v2, %v1403_v23  ;;  %2089 = vmatmul.mubr.msk.bf16.vlgmr.msra.gmra.mrb[0].mxu1 (%p1254_p7), %vm816_vm1, %v1425_v14 }
 0x47c   : > { %2093 = vmatpush3.bf16.msra.mxu1 (%p1254_p7), %v2208_v20  ;;  %2096 = vmatprep.mubr.msk.bf16.mxu1 (%p1254_p7), %vm2290_vm2, %v2289_v15 }
 0x47d   : >> { %v1405_v7 = vrot.slane %v1404_v6, 2  ;;  %2094 = vmatprep.subr.bf16.mxu1 (%p1254_p7), %v2289_v15 }
 0x47f   : >> { %v1406_v8 = vmax.f32 %v1404_v6, %v1405_v7 }
 0x480   : > { %1256 = sbr.rel (!%p1254_p7) target bundleno = 977 (0x3d1), region = 133  ;;  %2095 = vmatpush3.bf16.msra.mxu1 (%p1254_p7), %v2209_v21 }
 0x481   : >> { %v1407_v11 = vrot.slane %v1406_v8, 1  ;;  %2100 = vmatprep.subr.bf16.mxu1 (%p1254_p7), %v2289_v15 }
 0x483   : >> { %v1408_v12 = vmax.f32 %v1406_v8, %v1407_v11 }
 0x485   : >> { %v1412_v41 = vsel %vm1409_vm7, %v1408_v12, %v2282_v3  }
 0x486   : >> { %v2900_v3 = vmov %v1412_v41 }
 0x4f1   : > { %v1417_v26 = vpop.permute.xlu0 %1416 }
 0x4f2   : > { %vm1418_vm9 = vcmp.eq.s32.totalorder %v1417_v26, 1 }
 0x4f3   : > { %v1419_v27 = vsel %vm1418_vm9, %v1412_v41, 0.0 }
 0x4f4   : > { %v1420_v29 = vpack.c.bf16 %v1419_v27, %v1419_v27 }
 0x4f6   : > { %2097 = vmatmul.mubr.msk.bf16.vlgmr.msra.gmra.mrb[4].mxu1 %vm816_vm1, %v1420_v29 }
 0x4f7   : > { %2101 = vmatpush3.bf16.msra.mxu1 %v2210_v28  ;;  %2104 = vmatprep.mubr.msk.bf16.mxu1 %vm2290_vm2, %v2289_v15 }
 0x4f8   : > { %2102 = vmatprep.subr.bf16.mxu1 %v2289_v15 }
 0x4fb   : > { %2103 = vmatpush3.bf16.msra.mxu1 %v2211_v30 }
 0x4fc   : > { %2108 = vmatprep.subr.bf16.mxu1 %v2289_v15 }
 0x4fe   : > { %2105 = vmatmul.mubr.msk.bf16.vlgmr.msra.gmra.mrb[8].mxu1 %vm816_vm1, %v1540_v31 }
 0x4ff   : > { %2116 = vmatprep.mubr.msk.bf16.mxu1 %vm2290_vm2, %v2289_v15  ;;  %2109 = vmatpush3.bf16.msra.mxu1 %v2212_v32  ;;  %vm1650_vm2 = vcmask 523264  }
 0x500   : > { %2110 = vmatprep.subr.bf16.mxu1 %v2289_v15 }
 0x503   : > { %2111 = vmatpush3.bf16.msra.mxu1 %v2213_v34 }
 0x504   : > { %2112 = vmatprep.subr.bf16.mxu1 %v2289_v15 }
 0x507   : > { %2113 = vmatpush3.bf16.msra.mxu1 %v2214_v38 }
 0x508   : > { %2114 = vmatprep.subr.bf16.mxu1 %v2289_v15  ;;  %v1918_v15 = vld [vmem:[%s2888_s14] ss:$0 sm:$0xff] }
 0x50b   : > { %2115 = vmatpush3.bf16.msra.mxu1 %v2215_v39 }
 0x54e   : > { %v1479_v33 = vpop.f32.mrb[0].mxu1 }
 0x54f   : > { %v2090_v35 = vpop.f32.mrb[1].mxu1 }
 0x550   : > { %v1482_v36 = vpop.f32.mrb[2].mxu1 }
 0x551   : > { %v2091_v37 = vpop.f32.mrb[3].mxu1 }
 0x5c9   : > { %v1534_v43 = vpop.f32.mrb[4].mxu1 }
 0x5ca   : > { %v1535_v44 = vadd.f32 %v1534_v43, %v1479_v33  ;;  %v2098_v45 = vpop.f32.mrb[5].mxu1 }
 0x5cb   : > { %v1537_v46 = vpop.f32.mrb[6].mxu1 }
 0x5cc   : > { %v2099_v47 = vpop.f32.mrb[7].mxu1 }
 0x5d1   : > { %v1594_v48 = vpop.f32.mrb[8].mxu1 }
 0x5d2   : > { %v1600_v50 = vadd.f32 %v1594_v48, %v1535_v44  ;;  %v2106_v51 = vpop.f32.mrb[9].mxu1 }
 0x5d3   : > { %v1597_v52 = vpop.f32.mrb[10].mxu1 }
 0x5d4   : > { %v1608_v53 = vadd.f32 %v1911_v49, %v1600_v50  ;;  %v2107_v54 = vpop.f32.mrb[11].mxu1 }
 0x5d6   : > { %v1609_v55 = vmax.f32 %v1608_v53, 0.0 }
 0x5d8   : > { %v1610_v56 = vpack.c.bf16 %v1609_v55, %v1609_v55 }
 0x5da   : > { %2117 = vmatmul.mubr.msk.bf16.vlgmr.msra.gmra.mrb[12].mxu1 %vm1650_vm2, %v1610_v56 }
 0x6ad   : > { %v1688_v62 = vpop.f32.mrb[12].mxu1 }
 0x6ae   : > { %v1689_v63 = vadd.f32 %v1912_v59, %v1688_v62  ;;  %v2118_v3 = vpop.f32.mrb[13].mxu1 }
 0x6af   : > { %v1691_v5 = vpop.f32.mrb[14].mxu1 }
 0x6b0   : > { %v1694_v42 = vmax.f32 %v1689_v63, 0.0  ;;  %v2119_v61 = vpop.f32.mrb[15].mxu1 }
 0x6b2   : > { %v1695_v60 = vpack.c.bf16 %v1694_v42, %v1694_v42 }
 0x6b4   : > { %2125 = vmatmul.mubr.msk.bf16.vlgmr.msra.gmra.mrb[4].mxu0 %vm816_vm1, %v1695_v60 }
 0x787   : > { %v1756_v18 = vpop.f32.mrb[4].mxu0 }
 0x788   : > { %v1757_v19 = vadd.f32 %v1918_v15, %v1756_v18  ;;  %v2126_v16 = vpop.f32.mrb[5].mxu0 }
 0x789   : > { %v1759_v9 = vpop.f32.mrb[6].mxu0 }
 0x78a   : > { %1762 = vst [vmem:[#allocation4] sm:$0xff] %v1757_v19  ;;  %v2127_v17 = vpop.f32.mrb[7].mxu0 }
 0x78b PF: > { %s2901_s30 = sadd.s32 4294967295, %s2278_s20   ;;  %s2293_s17 = smov [#allocation4]  }
 0x78c   : > { %p2839_p8 = scmp.eq.s32.totalorder %s2901_s30, 2  ;;  %s1770_s23 = sshll.u32 %s2293_s17, 4  ;;  %s1771_s23 = int_to_ptr.vmem [resolvable:$true] %s1770_s23 }
 0x78d   : > { %s2218_s25 = scalar_lea.vmem %s1771_s23, 128  ;;  %p2225_p12 = scmp.lt.s32.totalorder %s1771_s23, %s1771_s23 }
 0x78e   : > { %p2219_p9 = scmp.ne.s32.totalorder %s1771_s23, %s2218_s25  ;;  %p2226_p13 = scmp.lt.s32.totalorder %s2218_s25, %s2218_s25 }
 0x790   : > { %p2220_p10 = pnand %p2219_p9, %p2839_p8  ;;  %p2227_p0 = por %p2226_p13, %p2225_p12 }
 0x792   : > { %p2221_p11 = pneg %p2220_p10 }
 0x794   : > { %p2228_p1 = pnand %p2227_p0, %p2221_p11 }
 0x796   : > { %2231 = shalt.err (!%p2228_p1)
}
 0x797   : > { %s2232_s24 = scalar_lea.hbm %s2889_s15, 128 }
 0x798   : > { %p2233_p2 = scmp.ne.s32.totalorder %s2889_s15, %s2232_s24  ;;  %p2238_p5 = scmp.lt.u32.totalorder %s2232_s24, %s2889_s15 }
 0x79a   : > { %p2234_p3 = pnand %p2233_p2, %p2839_p8 }
 0x79c   : > { %p2235_p4 = pneg %p2234_p3 }
 0x79e   : > { %p2240_p6 = pnand %p2238_p5, %p2235_p4 }
 0x7a0   : > { %2243 = shalt.err (!%p2240_p6)
}
 0x7a1   : > { %2129 = dma.vmem_to_hbm [thread:$0]  (%p2839_p8), %s1771_s23, 128, %s2889_s15, [#allocation5]  }
 0x7a2   : > { %2265 = dma.done.wait (%p2839_p8), [#allocation5], 128  }
 0x7a3   : > { %2267 = vsyncadd (%p2839_p8), [#allocation5], 4294967168 }
 0x7a4 PF: > { %s26_s20 = sadd.s32 1, %s2278_s20   ;;  %s2903_s17 = sld [smem:[#allocation7_spill]] }
 0x7a5   : > { %p23_p7 = scmp.ge.s32.totalorder %s26_s20, 5   ;;  %s2904_s18 = smov %s2274_s19 }
 0x7a7   :  { %25 = sbr.rel (!%p23_p7) target bundleno = 2 (0x2), region = 144 }
 0x7aa   : > { %s2905_s19 = smov %s2903_s17 }
 0x7ae   :  { %1783 = vsyncpa [#allocation5], 1 }
 0x7af   :  { %1785 = vsyncpa [#allocation5 + $0x1], 1 }

</bundles_post_ra>
